<compile_context>
chip_gen: v6e
topology: v6e:2x2x1
jax: 0.10.0
libtpu: 0.0.40
codegen_flags: <defaults>
</compile_context>

<pallas_src>
import functools

import jax
import jax.numpy as jnp
from jax.experimental import pallas as pl
from jax.experimental.pallas import tpu as pltpu


def _attend_aggregate(mask, f1_col, f2_row, src_ext_m, *, alpha):
    """Masked GAT attention + aggregation.

    s[i,j] = f1[i] + f2[j];  e_ij = exp(-leakyrelu(s_ij)) on edges, 0 elsewhere
    (up to a per-row positive factor that cancels in the rowsum normalization).
    `src_ext_m`'s LAST column must be all-ones so the row-sum of `e` falls out
    of the same MXU matmul as the feature aggregation.  `src_ext_m` is already
    in the MXU operand dtype (bf16 or f32).  Returns (N, src_ext.shape[1]) f32.
    """
    s = f1_col + f2_row                           # (N, N)
    t = jnp.maximum(s, alpha * s)                 # leakyrelu(s), one VPU max
    tm = jnp.where(mask, t, jnp.inf)              # single mask select
    # Row-wise stabilizer = min over edges; cancels exactly in the rowsum
    # normalization.  exp(cmin - tm) is 0 on masked lanes (exp(-inf)) -- no
    # second where, no +inf intermediates.
    cmin = jnp.min(tm, axis=1, keepdims=True)     # (N, 1), XLU reduce
    cmin = jnp.where(cmin == jnp.inf, 0.0, cmin)  # rows with no edges
    e = jnp.exp(cmin - tm)                        # (N, N), in [0, 1]
    return jnp.dot(e.astype(src_ext_m.dtype), src_ext_m,
                   preferred_element_type=jnp.float32)


def _spgat_fused_kernel(xe_ref, adj_ref, wp_ref, a2w_ref, wo_ref, w2o_ref,
                        out_ref, *, nheads, nhid, nclass, alpha, out_pad,
                        mxu_bf16):
    n = adj_ref.shape[0]
    fh = nheads * nhid
    md = jnp.bfloat16 if mxu_bf16 else jnp.float32   # MXU operand dtype

    # int8 adjacency -> mask via a cheap upcast+compare (keeps the mask in the
    # native 32-bit layout used by the f32 selects below).
    mask = adj_ref[...].astype(jnp.int32) != 0       # (N, N) bool

    # ---------------- stage 1: all attention heads ----------------
    # One wide MXU matmul: p = [h_0 | ... | h_{H-1} | 1 | f1_0 | ... | f1_{H-1}]
    xe_m = xe_ref[...].astype(md)
    p = jnp.dot(xe_m, wp_ref[...].astype(md),
                preferred_element_type=jnp.float32)          # (N, fh+1+H)
    h_ext = p[:, :fh + 1]                                    # all heads' h + ones col
    f1 = p[:, fh + 1:]                                       # (N, H)
    # f2[h, j] = a2_h . h_j for all heads in one dot_general.
    f2 = jax.lax.dot_general(a2w_ref[...].astype(md), xe_m,
                             (((1,), (1,)), ((), ())),
                             preferred_element_type=jnp.float32)   # (H, N)

    h_ext_m = h_ext.astype(md)    # cast once; reused by every head
    col1 = jax.lax.broadcasted_iota(jnp.int32, (n, fh + 1), 1)
    hcat = jnp.zeros((n, fh + 1), jnp.float32)
    # NOTE: static Python loop is fine at H=4/N=64; convert to lax.fori_loop
    # to bound live ranges if larger tiles show vreg spills.
    for hh in range(nheads):
        agg = _attend_aggregate(mask, f1[:, hh:hh + 1], f2[hh:hh + 1, :],
                                h_ext_m, alpha=alpha)        # (N, fh+1) f32
        rowsum = agg[:, fh:fh + 1]
        rowsum = jnp.where(rowsum > 0.0, rowsum, 1.0)  # isolated rows (ref: 0/0=NaN)
        # Full-width reciprocal+elu + iota-mask select instead of a 16-lane
        # masked store (no sub-128-lane vst, no VMEM scratch).
        hp = agg * pl.reciprocal(rowsum, approx=True)        # EUP recip
        z = jnp.where(hp > 0.0, hp, jnp.exp(hp) - 1.0)       # elu
        head_mask = (col1 >= hh * nhid) & (col1 < (hh + 1) * nhid)
        hcat = jnp.where(head_mask, z, hcat)
    hcat = jnp.where(col1 == fh, 1.0, hcat)                  # ones col for stage 2

    # -------- stage 2: out_att -> elu -> log_softmax (lane-dense) --------
    hc_m = hcat.astype(md)                                   # (N, fh+1)
    # po = [h_out (zero-padded) | ... | f1_out at out_pad-2 | 1 at out_pad-1]
    po = jnp.dot(hc_m, wo_ref[...].astype(md),
                 preferred_element_type=jnp.float32)         # (N, out_pad)
    f1o = po[:, out_pad - 2:out_pad - 1]                     # (N, 1)
    f2o = jax.lax.dot_general(w2o_ref[...].astype(md), hc_m,
                              (((1,), (1,)), ((), ())),
                              preferred_element_type=jnp.float32)   # (1, N)
    agg = _attend_aggregate(mask, f1o, f2o, po.astype(md), alpha=alpha)
    rowsum = agg[:, out_pad - 1:out_pad]
    rowsum = jnp.where(rowsum > 0.0, rowsum, 1.0)
    hp = agg / rowsum                              # exact divide for final output
    z = jnp.where(hp > 0.0, hp, jnp.exp(hp) - 1.0)           # elu
    # log_softmax over the real class columns only (padding masked out).
    colo = jax.lax.broadcasted_iota(jnp.int32, (n, out_pad), 1)
    valid = colo < nclass
    zm = jnp.where(valid, z, -jnp.inf)
    m = jnp.max(zm, axis=1, keepdims=True)
    lse = jnp.log(jnp.sum(jnp.exp(zm - m), axis=1, keepdims=True)) + m
    out_ref[...] = jnp.where(valid, z - lse, 0.0)  # one unmasked 128-wide store


def spgat_forward(params, x, adj, *, alpha, mxu_bf16=True):
    """Fused SpGAT forward (eval mode): heads + out_att + log_softmax in one
    pallas_call.  The packing below is tiny parameter-sized XLA work that
    algebraically folds the a1/a2 attention projections into the main
    projection matmuls."""
    n, nfeat = x.shape
    heads = params["attentions"]
    w_out, a_out = params["out_att"]
    nheads = len(heads)
    nhid = heads[0][0].shape[1]
    nclass = w_out.shape[1]
    fh = nheads * nhid
    out_pad = max(128, pl.cdiv(nclass + 2, 128) * 128)   # lane-dense output width
    f32 = jnp.float32

    w_stack = jnp.stack([w for (w, _) in heads], axis=0)          # (H, nfeat, nhid)
    a1 = jnp.stack([a[0, :nhid] for (_, a) in heads], axis=0)     # (H, nhid)
    a2 = jnp.stack([a[0, nhid:] for (_, a) in heads], axis=0)     # (H, nhid)

    # wp columns: [W_0 | ... | W_{H-1} | ones-selector | W_0@a1_0 | ... ]
    wp = jnp.zeros((nfeat + 1, fh + 1 + nheads), f32)
    wp = wp.at[:nfeat, :fh].set(jnp.concatenate([w for (w, _) in heads], axis=1))
    wp = wp.at[nfeat, fh].set(1.0)
    wp = wp.at[:nfeat, fh + 1:].set(jnp.einsum("hfk,hk->fh", w_stack, a1))
    # a2w[h, :] = W_h @ a2_h  (so f2 = a2w @ x^T); zero for the ones column.
    a2w = jnp.zeros((nheads, nfeat + 1), f32)
    a2w = a2w.at[:, :nfeat].set(jnp.einsum("hfk,hk->hf", w_stack, a2))

    a1o = a_out[0, :nclass]
    a2o = a_out[0, nclass:]
    # wo columns: [W_out | zeros | W_out@a1o at out_pad-2 | ones-selector at out_pad-1]
    wo = jnp.zeros((fh + 1, out_pad), f32)
    wo = wo.at[:fh, :nclass].set(w_out)
    wo = wo.at[:fh, out_pad - 2].set(w_out @ a1o)
    wo = wo.at[fh, out_pad - 1].set(1.0)
    # w2o: f2_out = w2o @ h_cat_ext^T; zero for the ones column.
    w2o = jnp.zeros((1, fh + 1), f32)
    w2o = w2o.at[0, :fh].set(w_out @ a2o)

    xe = jnp.concatenate([x.astype(f32), jnp.ones((n, 1), f32)], axis=1)
    adj_i8 = (adj != 0).astype(jnp.int8)     # 4x less DMA / VMEM than f32

    kernel = functools.partial(_spgat_fused_kernel, nheads=nheads, nhid=nhid,
                               nclass=nclass, alpha=alpha, out_pad=out_pad,
                               mxu_bf16=mxu_bf16)
    out = pl.pallas_call(
        kernel,
        out_shape=jax.ShapeDtypeStruct((n, out_pad), f32),
        grid=(1,),
        in_specs=[
            pl.BlockSpec((n, nfeat + 1), lambda i: (0, 0)),
            pl.BlockSpec((n, n), lambda i: (0, 0)),          # int8 adjacency
            pl.BlockSpec((nfeat + 1, fh + 1 + nheads), lambda i: (0, 0)),
            pl.BlockSpec((nheads, nfeat + 1), lambda i: (0, 0)),
            pl.BlockSpec((fh + 1, out_pad), lambda i: (0, 0)),
            pl.BlockSpec((1, fh + 1), lambda i: (0, 0)),
        ],
        out_specs=pl.BlockSpec((n, out_pad), lambda i: (0, 0)),
        compiler_params=pltpu.CompilerParams(
            dimension_semantics=("arbitrary",)),
    )(xe, adj_i8, wp, a2w, wo, w2o)
    return out[:, :nclass]


def xavier_normal(key, shape, gain=1.414):
    # torch.nn.init.xavier_normal_ for a 2-D tensor: fan_out=size(0), fan_in=size(1)
    fan_out, fan_in = shape
    std = gain * (2.0 / (fan_in + fan_out)) ** 0.5
    return std * jax.random.normal(key, shape, dtype=jnp.float32)


if __name__ == "__main__":
    N, nfeat, nhid, nclass, nheads = 64, 32, 16, 8, 4
    alpha, dropout = 0.2, 0.6   # dropout inactive (eval mode)

    key = jax.random.PRNGKey(0)
    keys = jax.random.split(key, 2 * nheads + 4)

    params = {"attentions": [], "out_att": None}
    for hidx in range(nheads):
        W = xavier_normal(keys[2 * hidx], (nfeat, nhid))
        a = xavier_normal(keys[2 * hidx + 1], (1, 2 * nhid))
        params["attentions"].append((W, a))
    W_out = xavier_normal(keys[2 * nheads], (nhid * nheads, nclass))
    a_out = xavier_normal(keys[2 * nheads + 1], (1, 2 * nclass))
    params["out_att"] = (W_out, a_out)

    x = jax.random.normal(keys[-2], (N, nfeat), dtype=jnp.float32)
    adj = (jax.random.uniform(keys[-1], (N, N)) < 0.15).astype(jnp.float32)
    adj = jnp.maximum(adj, jnp.eye(N, dtype=jnp.float32))   # self-loops -> rowsum > 0

    fwd_bf16 = jax.jit(functools.partial(spgat_forward, alpha=alpha, mxu_bf16=True))
    fwd_f32 = jax.jit(functools.partial(spgat_forward, alpha=alpha, mxu_bf16=False))
    out_bf16 = jax.block_until_ready(fwd_bf16(params, x, adj))
    out_f32 = jax.block_until_ready(fwd_f32(params, x, adj))
    assert out_bf16.shape == (N, nclass)
    assert out_f32.shape == (N, nclass)

    # Dense pure-JAX reference (original unfused formulation) for sanity.
    def ref_layer(xr, W, a, mode):
        h = xr @ W
        Fout = W.shape[1]
        f1 = h @ a[0, :Fout]
        f2 = h @ a[0, Fout:]
        s = f1[:, None] + f2[None, :]
        lr = jnp.where(s >= 0, s, alpha * s)
        e = jnp.where(adj != 0, jnp.exp(-lr), 0.0)
        hp = (e @ h) / jnp.sum(e, axis=1, keepdims=True)
        z = jnp.where(hp > 0, hp, jnp.exp(hp) - 1.0)
        if mode == "elu":
            return z
        return jax.nn.log_softmax(z, axis=1)

    hs = jnp.concatenate([ref_layer(x, W, a, "elu")
                          for (W, a) in params["attentions"]], axis=1)
    ref = ref_layer(hs, W_out, a_out, "out")

    # f32 MXU path: tight check (covers only the stage-1 approx reciprocal).
    err_f32 = float(jnp.max(jnp.abs(out_f32 - ref)))
    assert err_f32 < 5e-2, f"f32 path mismatch vs dense reference: {err_f32}"
    # bf16 MXU path (perf default): looser tolerance -- bf16 operand rounding
    # is amplified through the exp of the stage-2 attention logits.  Any real
    # algebra / indexing bug would still show up as an O(1) error.
    err_bf16 = float(jnp.max(jnp.abs(out_bf16 - ref)))
    assert err_bf16 < 2e-1, f"bf16 path mismatch vs dense reference: {err_bf16}"

    print("KERNEL_OK")
</pallas_src>

<mosaic_0001>
module attributes {stable_mosaic.version = 11 : i64} {
  func.func @_spgat_fused_kernel(%arg0: i32, %arg1: memref<64x33xf32, #tpu.memory_space<vmem>>, %arg2: memref<64x64xi8, #tpu.memory_space<vmem>>, %arg3: memref<33x69xf32, #tpu.memory_space<vmem>>, %arg4: memref<4x33xf32, #tpu.memory_space<vmem>>, %arg5: memref<65x128xf32, #tpu.memory_space<vmem>>, %arg6: memref<1x65xf32, #tpu.memory_space<vmem>>, %arg7: memref<64x128xf32, #tpu.memory_space<vmem>>) attributes {dimension_semantics = [#tpu.dimension_semantics<arbitrary>], iteration_bounds = array<i64: 1>, scalar_prefetch = 0 : i64, scratch_operands = 0 : i64, tpu.core_type = #tpu.core_type<tc>, window_params = [{pipeline_mode = #tpu.pipeline_mode<synchronous>, transform_indices = @transform_0, window_bounds = array<i64: 64, 33>}, {pipeline_mode = #tpu.pipeline_mode<synchronous>, transform_indices = @transform_1, window_bounds = array<i64: 64, 64>}, {pipeline_mode = #tpu.pipeline_mode<synchronous>, transform_indices = @transform_2, window_bounds = array<i64: 33, 69>}, {pipeline_mode = #tpu.pipeline_mode<synchronous>, transform_indices = @transform_3, window_bounds = array<i64: 4, 33>}, {pipeline_mode = #tpu.pipeline_mode<synchronous>, transform_indices = @transform_4, window_bounds = array<i64: 65, 128>}, {pipeline_mode = #tpu.pipeline_mode<synchronous>, transform_indices = @transform_5, window_bounds = array<i64: 1, 65>}, {pipeline_mode = #tpu.pipeline_mode<synchronous>, transform_indices = @transform_6, window_bounds = array<i64: 64, 128>}]} {
    %c0 = arith.constant 0 : index
    %c0_0 = arith.constant 0 : index
    %0 = vector.load %arg2[%c0, %c0_0] : memref<64x64xi8, #tpu.memory_space<vmem>>, vector<64x64xi8>
    %1 = arith.extsi %0 : vector<64x64xi8> to vector<64x64xi32>
    %c0_i32 = arith.constant 0 : i32
    %2 = vector.broadcast %c0_i32 : i32 to vector<64x64xi32>
    %3 = arith.cmpi ne, %1, %2 : vector<64x64xi32>
    %c0_1 = arith.constant 0 : index
    %c0_2 = arith.constant 0 : index
    %4 = vector.load %arg1[%c0_1, %c0_2] : memref<64x33xf32, #tpu.memory_space<vmem>>, vector<64x33xf32>
    %5 = arith.truncf %4 : vector<64x33xf32> to vector<64x33xbf16>
    %c0_3 = arith.constant 0 : index
    %c0_4 = arith.constant 0 : index
    %6 = vector.load %arg3[%c0_3, %c0_4] : memref<33x69xf32, #tpu.memory_space<vmem>>, vector<33x69xf32>
    %7 = arith.truncf %6 : vector<33x69xf32> to vector<33x69xbf16>
    %cst = arith.constant dense<0.000000e+00> : vector<64x69xf32>
    %8 = tpu.matmul %5, %7, %cst {dimension_numbers = #tpu.dot_dimension_numbers<[1], [0], [0], [1], [0, 0, 1, 1], [], []>} : vector<64x33xbf16>, vector<33x69xbf16>, vector<64x69xf32> -> vector<64x69xf32>
    %9 = vector.extract_strided_slice %8 {offsets = [0, 0], sizes = [64, 65], strides = [1, 1]} : vector<64x69xf32> to vector<64x65xf32>
    %10 = vector.extract_strided_slice %8 {offsets = [0, 65], sizes = [64, 4], strides = [1, 1]} : vector<64x69xf32> to vector<64x4xf32>
    %c0_5 = arith.constant 0 : index
    %c0_6 = arith.constant 0 : index
    %11 = vector.load %arg4[%c0_5, %c0_6] : memref<4x33xf32, #tpu.memory_space<vmem>>, vector<4x33xf32>
    %12 = arith.truncf %11 : vector<4x33xf32> to vector<4x33xbf16>
    %cst_7 = arith.constant dense<0.000000e+00> : vector<4x64xf32>
    %13 = tpu.matmul %12, %5, %cst_7 {dimension_numbers = #tpu.dot_dimension_numbers<[1], [1], [0], [0], [0, 0, 1, 0], [], []>} : vector<4x33xbf16>, vector<64x33xbf16>, vector<4x64xf32> -> vector<4x64xf32>
    %14 = arith.truncf %9 : vector<64x65xf32> to vector<64x65xbf16>
    %15 = tpu.iota {dimensions = array<i32: 1>} : vector<64x65xi32>
    %cst_8 = arith.constant 0.000000e+00 : f32
    %16 = vector.broadcast %cst_8 : f32 to vector<64x65xf32>
    %17 = vector.extract_strided_slice %10 {offsets = [0, 0], sizes = [64, 1], strides = [1, 1]} : vector<64x4xf32> to vector<64x1xf32>
    %18 = vector.extract_strided_slice %13 {offsets = [0, 0], sizes = [1, 64], strides = [1, 1]} : vector<4x64xf32> to vector<1x64xf32>
    %19 = vector.broadcast %17 : vector<64x1xf32> to vector<64x64xf32>
    %20 = vector.broadcast %18 : vector<1x64xf32> to vector<64x64xf32>
    %21 = arith.addf %19, %20 : vector<64x64xf32>
    %cst_9 = arith.constant 2.000000e-01 : f32
    %22 = vector.broadcast %cst_9 : f32 to vector<64x64xf32>
    %23 = arith.mulf %22, %21 : vector<64x64xf32>
    %24 = arith.maximumf %21, %23 : vector<64x64xf32>
    %cst_10 = arith.constant 0x7F800000 : f32
    %25 = vector.broadcast %cst_10 : f32 to vector<64x64xf32>
    %26 = arith.select %3, %24, %25 : vector<64x64xi1>, vector<64x64xf32>
    %cst_11 = arith.constant dense<0x7F800000> : vector<64xf32>
    %27 = vector.multi_reduction <minimumf>, %26, %cst_11 [1] : vector<64x64xf32> to vector<64xf32>
    %28 = vector.shape_cast %27 : vector<64xf32> to vector<64x1xf32>
    %cst_12 = arith.constant 0x7F800000 : f32
    %29 = vector.broadcast %cst_12 : f32 to vector<64x1xf32>
    %30 = arith.cmpf oeq, %28, %29 : vector<64x1xf32>
    %cst_13 = arith.constant 0.000000e+00 : f32
    %31 = vector.broadcast %cst_13 : f32 to vector<64x1xf32>
    %32 = arith.select %30, %31, %28 : vector<64x1xi1>, vector<64x1xf32>
    %33 = vector.broadcast %32 : vector<64x1xf32> to vector<64x64xf32>
    %34 = arith.subf %33, %26 : vector<64x64xf32>
    %35 = math.exp %34 : vector<64x64xf32>
    %36 = arith.truncf %35 : vector<64x64xf32> to vector<64x64xbf16>
    %cst_14 = arith.constant dense<0.000000e+00> : vector<64x65xf32>
    %37 = tpu.matmul %36, %14, %cst_14 {dimension_numbers = #tpu.dot_dimension_numbers<[1], [0], [0], [1], [0, 0, 1, 1], [], []>} : vector<64x64xbf16>, vector<64x65xbf16>, vector<64x65xf32> -> vector<64x65xf32>
    %38 = vector.extract_strided_slice %37 {offsets = [0, 64], sizes = [64, 1], strides = [1, 1]} : vector<64x65xf32> to vector<64x1xf32>
    %cst_15 = arith.constant 0.000000e+00 : f32
    %39 = vector.broadcast %cst_15 : f32 to vector<64x1xf32>
    %40 = arith.cmpf ogt, %38, %39 : vector<64x1xf32>
    %cst_16 = arith.constant 1.000000e+00 : f32
    %41 = vector.broadcast %cst_16 : f32 to vector<64x1xf32>
    %42 = arith.select %40, %38, %41 : vector<64x1xi1>, vector<64x1xf32>
    %43 = tpu.reciprocal %42 {approx = true} : vector<64x1xf32> -> vector<64x1xf32>
    %44 = vector.broadcast %43 : vector<64x1xf32> to vector<64x65xf32>
    %45 = arith.mulf %37, %44 : vector<64x65xf32>
    %cst_17 = arith.constant 0.000000e+00 : f32
    %46 = vector.broadcast %cst_17 : f32 to vector<64x65xf32>
    %47 = arith.cmpf ogt, %45, %46 : vector<64x65xf32>
    %48 = math.exp %45 : vector<64x65xf32>
    %cst_18 = arith.constant 1.000000e+00 : f32
    %49 = vector.broadcast %cst_18 : f32 to vector<64x65xf32>
    %50 = arith.subf %48, %49 : vector<64x65xf32>
    %51 = arith.select %47, %45, %50 : vector<64x65xi1>, vector<64x65xf32>
    %c0_i32_19 = arith.constant 0 : i32
    %52 = vector.broadcast %c0_i32_19 : i32 to vector<64x65xi32>
    %53 = arith.cmpi sge, %15, %52 : vector<64x65xi32>
    %c16_i32 = arith.constant 16 : i32
    %54 = vector.broadcast %c16_i32 : i32 to vector<64x65xi32>
    %55 = arith.cmpi slt, %15, %54 : vector<64x65xi32>
    %56 = arith.andi %53, %55 : vector<64x65xi1>
    %57 = arith.select %56, %51, %16 : vector<64x65xi1>, vector<64x65xf32>
    %58 = vector.extract_strided_slice %10 {offsets = [0, 1], sizes = [64, 1], strides = [1, 1]} : vector<64x4xf32> to vector<64x1xf32>
    %59 = vector.extract_strided_slice %13 {offsets = [1, 0], sizes = [1, 64], strides = [1, 1]} : vector<4x64xf32> to vector<1x64xf32>
    %60 = vector.broadcast %58 : vector<64x1xf32> to vector<64x64xf32>
    %61 = vector.broadcast %59 : vector<1x64xf32> to vector<64x64xf32>
    %62 = arith.addf %60, %61 : vector<64x64xf32>
    %cst_20 = arith.constant 2.000000e-01 : f32
    %63 = vector.broadcast %cst_20 : f32 to vector<64x64xf32>
    %64 = arith.mulf %63, %62 : vector<64x64xf32>
    %65 = arith.maximumf %62, %64 : vector<64x64xf32>
    %cst_21 = arith.constant 0x7F800000 : f32
    %66 = vector.broadcast %cst_21 : f32 to vector<64x64xf32>
    %67 = arith.select %3, %65, %66 : vector<64x64xi1>, vector<64x64xf32>
    %cst_22 = arith.constant dense<0x7F800000> : vector<64xf32>
    %68 = vector.multi_reduction <minimumf>, %67, %cst_22 [1] : vector<64x64xf32> to vector<64xf32>
    %69 = vector.shape_cast %68 : vector<64xf32> to vector<64x1xf32>
    %cst_23 = arith.constant 0x7F800000 : f32
    %70 = vector.broadcast %cst_23 : f32 to vector<64x1xf32>
    %71 = arith.cmpf oeq, %69, %70 : vector<64x1xf32>
    %cst_24 = arith.constant 0.000000e+00 : f32
    %72 = vector.broadcast %cst_24 : f32 to vector<64x1xf32>
    %73 = arith.select %71, %72, %69 : vector<64x1xi1>, vector<64x1xf32>
    %74 = vector.broadcast %73 : vector<64x1xf32> to vector<64x64xf32>
    %75 = arith.subf %74, %67 : vector<64x64xf32>
    %76 = math.exp %75 : vector<64x64xf32>
    %77 = arith.truncf %76 : vector<64x64xf32> to vector<64x64xbf16>
    %cst_25 = arith.constant dense<0.000000e+00> : vector<64x65xf32>
    %78 = tpu.matmul %77, %14, %cst_25 {dimension_numbers = #tpu.dot_dimension_numbers<[1], [0], [0], [1], [0, 0, 1, 1], [], []>} : vector<64x64xbf16>, vector<64x65xbf16>, vector<64x65xf32> -> vector<64x65xf32>
    %79 = vector.extract_strided_slice %78 {offsets = [0, 64], sizes = [64, 1], strides = [1, 1]} : vector<64x65xf32> to vector<64x1xf32>
    %cst_26 = arith.constant 0.000000e+00 : f32
    %80 = vector.broadcast %cst_26 : f32 to vector<64x1xf32>
    %81 = arith.cmpf ogt, %79, %80 : vector<64x1xf32>
    %cst_27 = arith.constant 1.000000e+00 : f32
    %82 = vector.broadcast %cst_27 : f32 to vector<64x1xf32>
    %83 = arith.select %81, %79, %82 : vector<64x1xi1>, vector<64x1xf32>
    %84 = tpu.reciprocal %83 {approx = true} : vector<64x1xf32> -> vector<64x1xf32>
    %85 = vector.broadcast %84 : vector<64x1xf32> to vector<64x65xf32>
    %86 = arith.mulf %78, %85 : vector<64x65xf32>
    %cst_28 = arith.constant 0.000000e+00 : f32
    %87 = vector.broadcast %cst_28 : f32 to vector<64x65xf32>
    %88 = arith.cmpf ogt, %86, %87 : vector<64x65xf32>
    %89 = math.exp %86 : vector<64x65xf32>
    %cst_29 = arith.constant 1.000000e+00 : f32
    %90 = vector.broadcast %cst_29 : f32 to vector<64x65xf32>
    %91 = arith.subf %89, %90 : vector<64x65xf32>
    %92 = arith.select %88, %86, %91 : vector<64x65xi1>, vector<64x65xf32>
    %c16_i32_30 = arith.constant 16 : i32
    %93 = vector.broadcast %c16_i32_30 : i32 to vector<64x65xi32>
    %94 = arith.cmpi sge, %15, %93 : vector<64x65xi32>
    %c32_i32 = arith.constant 32 : i32
    %95 = vector.broadcast %c32_i32 : i32 to vector<64x65xi32>
    %96 = arith.cmpi slt, %15, %95 : vector<64x65xi32>
    %97 = arith.andi %94, %96 : vector<64x65xi1>
    %98 = arith.select %97, %92, %57 : vector<64x65xi1>, vector<64x65xf32>
    %99 = vector.extract_strided_slice %10 {offsets = [0, 2], sizes = [64, 1], strides = [1, 1]} : vector<64x4xf32> to vector<64x1xf32>
    %100 = vector.extract_strided_slice %13 {offsets = [2, 0], sizes = [1, 64], strides = [1, 1]} : vector<4x64xf32> to vector<1x64xf32>
    %101 = vector.broadcast %99 : vector<64x1xf32> to vector<64x64xf32>
    %102 = vector.broadcast %100 : vector<1x64xf32> to vector<64x64xf32>
    %103 = arith.addf %101, %102 : vector<64x64xf32>
    %cst_31 = arith.constant 2.000000e-01 : f32
    %104 = vector.broadcast %cst_31 : f32 to vector<64x64xf32>
    %105 = arith.mulf %104, %103 : vector<64x64xf32>
    %106 = arith.maximumf %103, %105 : vector<64x64xf32>
    %cst_32 = arith.constant 0x7F800000 : f32
    %107 = vector.broadcast %cst_32 : f32 to vector<64x64xf32>
    %108 = arith.select %3, %106, %107 : vector<64x64xi1>, vector<64x64xf32>
    %cst_33 = arith.constant dense<0x7F800000> : vector<64xf32>
    %109 = vector.multi_reduction <minimumf>, %108, %cst_33 [1] : vector<64x64xf32> to vector<64xf32>
    %110 = vector.shape_cast %109 : vector<64xf32> to vector<64x1xf32>
    %cst_34 = arith.constant 0x7F800000 : f32
    %111 = vector.broadcast %cst_34 : f32 to vector<64x1xf32>
    %112 = arith.cmpf oeq, %110, %111 : vector<64x1xf32>
    %cst_35 = arith.constant 0.000000e+00 : f32
    %113 = vector.broadcast %cst_35 : f32 to vector<64x1xf32>
    %114 = arith.select %112, %113, %110 : vector<64x1xi1>, vector<64x1xf32>
    %115 = vector.broadcast %114 : vector<64x1xf32> to vector<64x64xf32>
    %116 = arith.subf %115, %108 : vector<64x64xf32>
    %117 = math.exp %116 : vector<64x64xf32>
    %118 = arith.truncf %117 : vector<64x64xf32> to vector<64x64xbf16>
    %cst_36 = arith.constant dense<0.000000e+00> : vector<64x65xf32>
    %119 = tpu.matmul %118, %14, %cst_36 {dimension_numbers = #tpu.dot_dimension_numbers<[1], [0], [0], [1], [0, 0, 1, 1], [], []>} : vector<64x64xbf16>, vector<64x65xbf16>, vector<64x65xf32> -> vector<64x65xf32>
    %120 = vector.extract_strided_slice %119 {offsets = [0, 64], sizes = [64, 1], strides = [1, 1]} : vector<64x65xf32> to vector<64x1xf32>
    %cst_37 = arith.constant 0.000000e+00 : f32
    %121 = vector.broadcast %cst_37 : f32 to vector<64x1xf32>
    %122 = arith.cmpf ogt, %120, %121 : vector<64x1xf32>
    %cst_38 = arith.constant 1.000000e+00 : f32
    %123 = vector.broadcast %cst_38 : f32 to vector<64x1xf32>
    %124 = arith.select %122, %120, %123 : vector<64x1xi1>, vector<64x1xf32>
    %125 = tpu.reciprocal %124 {approx = true} : vector<64x1xf32> -> vector<64x1xf32>
    %126 = vector.broadcast %125 : vector<64x1xf32> to vector<64x65xf32>
    %127 = arith.mulf %119, %126 : vector<64x65xf32>
    %cst_39 = arith.constant 0.000000e+00 : f32
    %128 = vector.broadcast %cst_39 : f32 to vector<64x65xf32>
    %129 = arith.cmpf ogt, %127, %128 : vector<64x65xf32>
    %130 = math.exp %127 : vector<64x65xf32>
    %cst_40 = arith.constant 1.000000e+00 : f32
    %131 = vector.broadcast %cst_40 : f32 to vector<64x65xf32>
    %132 = arith.subf %130, %131 : vector<64x65xf32>
    %133 = arith.select %129, %127, %132 : vector<64x65xi1>, vector<64x65xf32>
    %c32_i32_41 = arith.constant 32 : i32
    %134 = vector.broadcast %c32_i32_41 : i32 to vector<64x65xi32>
    %135 = arith.cmpi sge, %15, %134 : vector<64x65xi32>
    %c48_i32 = arith.constant 48 : i32
    %136 = vector.broadcast %c48_i32 : i32 to vector<64x65xi32>
    %137 = arith.cmpi slt, %15, %136 : vector<64x65xi32>
    %138 = arith.andi %135, %137 : vector<64x65xi1>
    %139 = arith.select %138, %133, %98 : vector<64x65xi1>, vector<64x65xf32>
    %140 = vector.extract_strided_slice %10 {offsets = [0, 3], sizes = [64, 1], strides = [1, 1]} : vector<64x4xf32> to vector<64x1xf32>
    %141 = vector.extract_strided_slice %13 {offsets = [3, 0], sizes = [1, 64], strides = [1, 1]} : vector<4x64xf32> to vector<1x64xf32>
    %142 = vector.broadcast %140 : vector<64x1xf32> to vector<64x64xf32>
    %143 = vector.broadcast %141 : vector<1x64xf32> to vector<64x64xf32>
    %144 = arith.addf %142, %143 : vector<64x64xf32>
    %cst_42 = arith.constant 2.000000e-01 : f32
    %145 = vector.broadcast %cst_42 : f32 to vector<64x64xf32>
    %146 = arith.mulf %145, %144 : vector<64x64xf32>
    %147 = arith.maximumf %144, %146 : vector<64x64xf32>
    %cst_43 = arith.constant 0x7F800000 : f32
    %148 = vector.broadcast %cst_43 : f32 to vector<64x64xf32>
    %149 = arith.select %3, %147, %148 : vector<64x64xi1>, vector<64x64xf32>
    %cst_44 = arith.constant dense<0x7F800000> : vector<64xf32>
    %150 = vector.multi_reduction <minimumf>, %149, %cst_44 [1] : vector<64x64xf32> to vector<64xf32>
    %151 = vector.shape_cast %150 : vector<64xf32> to vector<64x1xf32>
    %cst_45 = arith.constant 0x7F800000 : f32
    %152 = vector.broadcast %cst_45 : f32 to vector<64x1xf32>
    %153 = arith.cmpf oeq, %151, %152 : vector<64x1xf32>
    %cst_46 = arith.constant 0.000000e+00 : f32
    %154 = vector.broadcast %cst_46 : f32 to vector<64x1xf32>
    %155 = arith.select %153, %154, %151 : vector<64x1xi1>, vector<64x1xf32>
    %156 = vector.broadcast %155 : vector<64x1xf32> to vector<64x64xf32>
    %157 = arith.subf %156, %149 : vector<64x64xf32>
    %158 = math.exp %157 : vector<64x64xf32>
    %159 = arith.truncf %158 : vector<64x64xf32> to vector<64x64xbf16>
    %cst_47 = arith.constant dense<0.000000e+00> : vector<64x65xf32>
    %160 = tpu.matmul %159, %14, %cst_47 {dimension_numbers = #tpu.dot_dimension_numbers<[1], [0], [0], [1], [0, 0, 1, 1], [], []>} : vector<64x64xbf16>, vector<64x65xbf16>, vector<64x65xf32> -> vector<64x65xf32>
    %161 = vector.extract_strided_slice %160 {offsets = [0, 64], sizes = [64, 1], strides = [1, 1]} : vector<64x65xf32> to vector<64x1xf32>
    %cst_48 = arith.constant 0.000000e+00 : f32
    %162 = vector.broadcast %cst_48 : f32 to vector<64x1xf32>
    %163 = arith.cmpf ogt, %161, %162 : vector<64x1xf32>
    %cst_49 = arith.constant 1.000000e+00 : f32
    %164 = vector.broadcast %cst_49 : f32 to vector<64x1xf32>
    %165 = arith.select %163, %161, %164 : vector<64x1xi1>, vector<64x1xf32>
    %166 = tpu.reciprocal %165 {approx = true} : vector<64x1xf32> -> vector<64x1xf32>
    %167 = vector.broadcast %166 : vector<64x1xf32> to vector<64x65xf32>
    %168 = arith.mulf %160, %167 : vector<64x65xf32>
    %cst_50 = arith.constant 0.000000e+00 : f32
    %169 = vector.broadcast %cst_50 : f32 to vector<64x65xf32>
    %170 = arith.cmpf ogt, %168, %169 : vector<64x65xf32>
    %171 = math.exp %168 : vector<64x65xf32>
    %cst_51 = arith.constant 1.000000e+00 : f32
    %172 = vector.broadcast %cst_51 : f32 to vector<64x65xf32>
    %173 = arith.subf %171, %172 : vector<64x65xf32>
    %174 = arith.select %170, %168, %173 : vector<64x65xi1>, vector<64x65xf32>
    %c48_i32_52 = arith.constant 48 : i32
    %175 = vector.broadcast %c48_i32_52 : i32 to vector<64x65xi32>
    %176 = arith.cmpi sge, %15, %175 : vector<64x65xi32>
    %c64_i32 = arith.constant 64 : i32
    %177 = vector.broadcast %c64_i32 : i32 to vector<64x65xi32>
    %178 = arith.cmpi slt, %15, %177 : vector<64x65xi32>
    %179 = arith.andi %176, %178 : vector<64x65xi1>
    %180 = arith.select %179, %174, %139 : vector<64x65xi1>, vector<64x65xf32>
    %c64_i32_53 = arith.constant 64 : i32
    %181 = vector.broadcast %c64_i32_53 : i32 to vector<64x65xi32>
    %182 = arith.cmpi eq, %15, %181 : vector<64x65xi32>
    %cst_54 = arith.constant 1.000000e+00 : f32
    %183 = vector.broadcast %cst_54 : f32 to vector<64x65xf32>
    %184 = arith.select %182, %183, %180 : vector<64x65xi1>, vector<64x65xf32>
    %185 = arith.truncf %184 : vector<64x65xf32> to vector<64x65xbf16>
    %c0_55 = arith.constant 0 : index
    %c0_56 = arith.constant 0 : index
    %186 = vector.load %arg5[%c0_55, %c0_56] : memref<65x128xf32, #tpu.memory_space<vmem>>, vector<65x128xf32>
    %187 = arith.truncf %186 : vector<65x128xf32> to vector<65x128xbf16>
    %cst_57 = arith.constant dense<0.000000e+00> : vector<64x128xf32>
    %188 = tpu.matmul %185, %187, %cst_57 {dimension_numbers = #tpu.dot_dimension_numbers<[1], [0], [0], [1], [0, 0, 1, 1], [], []>} : vector<64x65xbf16>, vector<65x128xbf16>, vector<64x128xf32> -> vector<64x128xf32>
    %189 = vector.extract_strided_slice %188 {offsets = [0, 126], sizes = [64, 1], strides = [1, 1]} : vector<64x128xf32> to vector<64x1xf32>
    %c0_58 = arith.constant 0 : index
    %c0_59 = arith.constant 0 : index
    %190 = vector.load %arg6[%c0_58, %c0_59] : memref<1x65xf32, #tpu.memory_space<vmem>>, vector<1x65xf32>
    %191 = arith.truncf %190 : vector<1x65xf32> to vector<1x65xbf16>
    %cst_60 = arith.constant dense<0.000000e+00> : vector<1x64xf32>
    %192 = tpu.matmul %191, %185, %cst_60 {dimension_numbers = #tpu.dot_dimension_numbers<[1], [1], [0], [0], [0, 0, 1, 0], [], []>} : vector<1x65xbf16>, vector<64x65xbf16>, vector<1x64xf32> -> vector<1x64xf32>
    %193 = arith.truncf %188 : vector<64x128xf32> to vector<64x128xbf16>
    %194 = vector.broadcast %189 : vector<64x1xf32> to vector<64x64xf32>
    %195 = vector.broadcast %192 : vector<1x64xf32> to vector<64x64xf32>
    %196 = arith.addf %194, %195 : vector<64x64xf32>
    %cst_61 = arith.constant 2.000000e-01 : f32
    %197 = vector.broadcast %cst_61 : f32 to vector<64x64xf32>
    %198 = arith.mulf %197, %196 : vector<64x64xf32>
    %199 = arith.maximumf %196, %198 : vector<64x64xf32>
    %cst_62 = arith.constant 0x7F800000 : f32
    %200 = vector.broadcast %cst_62 : f32 to vector<64x64xf32>
    %201 = arith.select %3, %199, %200 : vector<64x64xi1>, vector<64x64xf32>
    %cst_63 = arith.constant dense<0x7F800000> : vector<64xf32>
    %202 = vector.multi_reduction <minimumf>, %201, %cst_63 [1] : vector<64x64xf32> to vector<64xf32>
    %203 = vector.shape_cast %202 : vector<64xf32> to vector<64x1xf32>
    %cst_64 = arith.constant 0x7F800000 : f32
    %204 = vector.broadcast %cst_64 : f32 to vector<64x1xf32>
    %205 = arith.cmpf oeq, %203, %204 : vector<64x1xf32>
    %cst_65 = arith.constant 0.000000e+00 : f32
    %206 = vector.broadcast %cst_65 : f32 to vector<64x1xf32>
    %207 = arith.select %205, %206, %203 : vector<64x1xi1>, vector<64x1xf32>
    %208 = vector.broadcast %207 : vector<64x1xf32> to vector<64x64xf32>
    %209 = arith.subf %208, %201 : vector<64x64xf32>
    %210 = math.exp %209 : vector<64x64xf32>
    %211 = arith.truncf %210 : vector<64x64xf32> to vector<64x64xbf16>
    %cst_66 = arith.constant dense<0.000000e+00> : vector<64x128xf32>
    %212 = tpu.matmul %211, %193, %cst_66 {dimension_numbers = #tpu.dot_dimension_numbers<[1], [0], [0], [1], [0, 0, 1, 1], [], []>} : vector<64x64xbf16>, vector<64x128xbf16>, vector<64x128xf32> -> vector<64x128xf32>
    %213 = vector.extract_strided_slice %212 {offsets = [0, 127], sizes = [64, 1], strides = [1, 1]} : vector<64x128xf32> to vector<64x1xf32>
    %cst_67 = arith.constant 0.000000e+00 : f32
    %214 = vector.broadcast %cst_67 : f32 to vector<64x1xf32>
    %215 = arith.cmpf ogt, %213, %214 : vector<64x1xf32>
    %cst_68 = arith.constant 1.000000e+00 : f32
    %216 = vector.broadcast %cst_68 : f32 to vector<64x1xf32>
    %217 = arith.select %215, %213, %216 : vector<64x1xi1>, vector<64x1xf32>
    %218 = vector.broadcast %217 : vector<64x1xf32> to vector<64x128xf32>
    %219 = arith.divf %212, %218 : vector<64x128xf32>
    %cst_69 = arith.constant 0.000000e+00 : f32
    %220 = vector.broadcast %cst_69 : f32 to vector<64x128xf32>
    %221 = arith.cmpf ogt, %219, %220 : vector<64x128xf32>
    %222 = math.exp %219 : vector<64x128xf32>
    %cst_70 = arith.constant 1.000000e+00 : f32
    %223 = vector.broadcast %cst_70 : f32 to vector<64x128xf32>
    %224 = arith.subf %222, %223 : vector<64x128xf32>
    %225 = arith.select %221, %219, %224 : vector<64x128xi1>, vector<64x128xf32>
    %226 = tpu.iota {dimensions = array<i32: 1>} : vector<64x128xi32>
    %c8_i32 = arith.constant 8 : i32
    %227 = vector.broadcast %c8_i32 : i32 to vector<64x128xi32>
    %228 = arith.cmpi slt, %226, %227 : vector<64x128xi32>
    %cst_71 = arith.constant 0xFF800000 : f32
    %229 = vector.broadcast %cst_71 : f32 to vector<64x128xf32>
    %230 = arith.select %228, %225, %229 : vector<64x128xi1>, vector<64x128xf32>
    %cst_72 = arith.constant dense<0xFF800000> : vector<64xf32>
    %231 = vector.multi_reduction <maximumf>, %230, %cst_72 [1] : vector<64x128xf32> to vector<64xf32>
    %232 = vector.shape_cast %231 : vector<64xf32> to vector<64x1xf32>
    %233 = vector.broadcast %232 : vector<64x1xf32> to vector<64x128xf32>
    %234 = arith.subf %230, %233 : vector<64x128xf32>
    %235 = math.exp %234 : vector<64x128xf32>
    %cst_73 = arith.constant dense<0.000000e+00> : vector<64xf32>
    %236 = vector.multi_reduction <add>, %235, %cst_73 [1] : vector<64x128xf32> to vector<64xf32>
    %237 = vector.shape_cast %236 : vector<64xf32> to vector<64x1xf32>
    %238 = math.log %237 : vector<64x1xf32>
    %239 = arith.addf %238, %232 : vector<64x1xf32>
    %240 = vector.broadcast %239 : vector<64x1xf32> to vector<64x128xf32>
    %241 = arith.subf %225, %240 : vector<64x128xf32>
    %cst_74 = arith.constant 0.000000e+00 : f32
    %242 = vector.broadcast %cst_74 : f32 to vector<64x128xf32>
    %243 = arith.select %228, %241, %242 : vector<64x128xi1>, vector<64x128xf32>
    %c0_75 = arith.constant 0 : index
    %c0_76 = arith.constant 0 : index
    %244 = vector.load %arg7[%c0_75, %c0_76] : memref<64x128xf32, #tpu.memory_space<vmem>>, vector<64x128xf32>
    tpu.vector_store %arg7[%c0_75, %c0_76], %243 {strides = array<i32>} : memref<64x128xf32, #tpu.memory_space<vmem>>, vector<64x128xf32>,
    return
  }
  func.func @transform_0(%arg0: i32) -> (i32, i32) {
    %c0_i32 = arith.constant 0 : i32
    %c0_i32_0 = arith.constant 0 : i32
    %c0_i32_1 = arith.constant 0 : i32
    return %c0_i32, %c0_i32_0 : i32, i32
  }
  func.func @transform_1(%arg0: i32) -> (i32, i32) {
    %c0_i32 = arith.constant 0 : i32
    %c0_i32_0 = arith.constant 0 : i32
    %c0_i32_1 = arith.constant 0 : i32
    return %c0_i32, %c0_i32_0 : i32, i32
  }
  func.func @transform_2(%arg0: i32) -> (i32, i32) {
    %c0_i32 = arith.constant 0 : i32
    %c0_i32_0 = arith.constant 0 : i32
    %c0_i32_1 = arith.constant 0 : i32
    return %c0_i32, %c0_i32_0 : i32, i32
  }
  func.func @transform_3(%arg0: i32) -> (i32, i32) {
    %c0_i32 = arith.constant 0 : i32
    %c0_i32_0 = arith.constant 0 : i32
    %c0_i32_1 = arith.constant 0 : i32
    return %c0_i32, %c0_i32_0 : i32, i32
  }
  func.func @transform_4(%arg0: i32) -> (i32, i32) {
    %c0_i32 = arith.constant 0 : i32
    %c0_i32_0 = arith.constant 0 : i32
    %c0_i32_1 = arith.constant 0 : i32
    return %c0_i32, %c0_i32_0 : i32, i32
  }
  func.func @transform_5(%arg0: i32) -> (i32, i32) {
    %c0_i32 = arith.constant 0 : i32
    %c0_i32_0 = arith.constant 0 : i32
    %c0_i32_1 = arith.constant 0 : i32
    return %c0_i32, %c0_i32_0 : i32, i32
  }
  func.func @transform_6(%arg0: i32) -> (i32, i32) {
    %c0_i32 = arith.constant 0 : i32
    %c0_i32_0 = arith.constant 0 : i32
    %c0_i32_1 = arith.constant 0 : i32
    return %c0_i32, %c0_i32_0 : i32, i32
  }
}

</mosaic_0001>

<bundles_post_ra>
// kernel: spgat_forward.1
= control target key start
LH: loop header
LB: loop body
LE: loop exit
PB: predicated region body
PF: predicated region fallthrough
CT: control target
= control target key end

     0   :  { %vm75_vm0 = vcmask 1040384   ;;  %v2735_v1 = vmov 0   ;;  %v4039_v4 = vmov 0.0   ;;  %vm62_vm1 = vcmask 269312   ;;  %s4030_s2 = inlined_call_operand.vmem [shape: f32[33,69], index: 2, kind: input, shape index: {}]   ;;  %s4031_s0 = inlined_call_operand.vmem [shape: f32[64,33], index: 0, kind: input, shape index: {}]   ;;  %s4032_s3 = inlined_call_operand.vmem [shape: f32[4,33], index: 3, kind: input, shape index: {}]   ;;  %s4033_s4 = inlined_call_operand.vmem [shape: f32[65,128], index: 4, kind: input, shape index: {}]   ;;  %s4034_s1 = inlined_call_operand.vmem [shape: s8[64,64], index: 1, kind: input, shape index: {}]   ;;  %s4035_s5 = inlined_call_operand.vmem [shape: f32[1,65], index: 5, kind: input, shape index: {}]   ;;  %s4036_s6 = inlined_call_operand.vmem [shape: f32[64,128], index: 6, kind: output, shape index: {}]  }
   0x1   :  { %v58_v0 = vld [vmem:[%s4030_s2 + $0x20] sm:$0x1]  ;;  %v2783_v2 = vsel %vm75_vm0, 65535, %v2735_v1  ;;  %v56_v3 = vld [vmem:[%s4030_s2 + $0x10] sm:$0xff]  ;;  %2307 = vmatprep.subr.bf16.mxu1 %v4039_v4  ;;  %v57_v6 = vld [vmem:[%s4030_s2 + $0x18] sm:$0xff]  ;;  %vm2737_vm2 = vmmov 0   ;;  %v4038_v42 = vlaneseq }
   0x2   :  { %v61_v5 = vpack.c.bf16 %v58_v0, %v58_v0  ;;  %v42_v7 = vld [vmem:[%s4031_s0] sm:$0xff]  ;;  %v43_v8 = vld [vmem:[%s4031_s0 + $0x8] sm:$0xff]  ;;  %2315 = vmatprep.mubr.msk.bf16.mxu1 %vm2737_vm2, %v4039_v4  ;;  %v2738_v9 = vmov 65   ;;  %v60_v11 = vpack.c.bf16 %v57_v6, %v56_v3  ;;  %v48_v15 = vld [vmem:[%s4031_s0 + $0x30] sm:$0xff]  ;;  %v2739_v34 = vmov 66  }
   0x3   :  { %2439 = vset.pattern.permute.xlu1 %v2738_v9  ;;  %v54_v12 = vld [vmem:[%s4030_s2] sm:$0xff]  ;;  %v50_v13 = vpack.c.bf16 %v43_v8, %v42_v7  ;;  %2442 = vset.pattern.permute.xlu0 %v2738_v9  ;;  %v55_v14 = vld [vmem:[%s4030_s2 + $0x8] sm:$0xff]  ;;  %v49_v16 = vld [vmem:[%s4031_s0 + $0x38] sm:$0xff]  ;;  %v2740_v36 = vmov 68   ;;  %v2741_v38 = vmov 67   ;;  %v2883_v45 = vshrl.u32 %v4038_v42, 7 }
   0x4   :  { %v79_v10 = vand.u32 %v2783_v2, %v61_v5  ;;  %v53_v17 = vpack.c.bf16 %v49_v16, %v48_v15  ;;  %v59_v18 = vpack.c.bf16 %v55_v14, %v54_v12  ;;  %v46_v20 = vld [vmem:[%s4031_s0 + $0x20] sm:$0xff]  ;;  %v47_v21 = vld [vmem:[%s4031_s0 + $0x28] sm:$0xff]  ;;  %v44_v22 = vld [vmem:[%s4031_s0 + $0x10] sm:$0xff]  ;;  %vm4042_vm4 = vcmask 523264  }
   0x5   :  { %2299 = vmatprep.mubr.msk.bf16.mxu0 %vm62_vm1, %v50_v13  ;;  %v45_v23 = vld [vmem:[%s4031_s0 + $0x18] sm:$0xff]  ;;  %v52_v24 = vpack.c.bf16 %v47_v21, %v46_v20  ;;  %v64_v28 = vsel %vm62_vm1, %v50_v13, 0  ;;  %v146_v29 = vld [vmem:[%s4032_s3] sm:$0xf]  ;;  %v912_v47 = vsub.s32 2, %v2883_v45  ;;  %v1248_v48 = vsub.s32 3, %v2883_v45 }
   0x6   :  { %2293 = vmatprep.subr.bf16.mxu0 %v79_v10  ;;  %v73_v19 = vsel %vm62_vm1, %v53_v17, 0  ;;  %v51_v25 = vpack.c.bf16 %v45_v23, %v44_v22  ;;  %v147_v30 = vpack.c.bf16 %v146_v29, %v146_v29  ;;  %v1571_v49 = vld [vmem:[%s4033_s4 + $0x40] sm:$0x1]  ;;  %v4037_v59 = vsub.s32 0, %v2883_v45 }
   0x7   :  { %2294 = vmatpush3.bf16.msra.mxu0 %v79_v10  ;;  %2308 = vmatpush3.bf16.xpose.msra.mxu1 %v73_v19  ;;  %v70_v26 = vsel %vm62_vm1, %v52_v24, 0  ;;  %v1576_v51 = vpack.c.bf16 %v1571_v49, %v1571_v49  ;;  %v2963_v61 = vld [vmem:[%s4034_s1] sm:$0xff]  ;;  %v576_v62 = vsub.s32 1, %v2883_v45 }
   0x8   :  { %2295 = vmatprep.subr.bf16.mxu0 %v60_v11  ;;  %2309 = vmatprep.subr.bf16.mxu1 %v4039_v4  ;;  %v67_v27 = vsel %vm62_vm1, %v51_v25, 0  ;;  %v28_v0 = vunpack.c.2.s8 %v2963_v61  ;;  %v26_v5 = vunpack.c.0.s8 %v2963_v61  ;;  %v29_v29 = vunpack.c.3.s8 %v2963_v61 }
   0x9   :  { %v2920_v57 = vand.u32 %v1576_v51, %v2783_v2 }
   0xa   :  { %vm2972_vm3 = vcmp.ne.s32.totalorder %v28_v0, 0  ;;  %vm2977_vm5 = vcmp.ne.s32.totalorder %v26_v5, 0  ;;  %vm3007_vm6 = vcmp.ne.s32.totalorder %v29_v29, 0  ;;  %v3032_v0 = vld [vmem:[%s4034_s1 + $0x8] sm:$0xff] }
   0xb   :  { %2296 = vmatpush3.bf16.msra.mxu0 %v60_v11 }
   0xc   :  { %2297 = vmatprep.subr.bf16.mxu0 %v59_v18 }
   0xf   :  { %2298 = vmatpush3.bf16.msra.mxu0 %v59_v18  ;;  %2310 = vmatpush3.bf16.xpose.msra.mxu1 %v70_v26 }
  0x10   :  { %2311 = vmatprep.subr.bf16.mxu1 %v4039_v4 }
  0x12   :  { %2300 = vmatmul.mubr.msk.bf16.vlgmr.msra.gmra.mxu0 %vm62_vm1, %v51_v25 }
  0x13   :  { %2303 = vmatprep.mubr.msk.bf16.mxu0 %vm62_vm1, %v52_v24 }
  0x17   :  { %2312 = vmatpush3.bf16.xpose.msra.mxu1 %v67_v27 }
  0x18   :  { %2313 = vmatprep.subr.bf16.mxu1 %v4039_v4 }
  0x1a   :  { %2304 = vmatmul.mubr.msk.bf16.gmra.mxu0 %vm62_vm1, %v53_v17 }
  0x1f   :  { %2314 = vmatpush3.bf16.xpose.msra.mxu1 %v64_v28 }
  0x26   :  { %2316 = vmatmul.mubr.msk.bf16.vlgmr.msra.gmra.mxu1 %vm62_vm1, %v147_v30 }
  0xd2   :  { %v2842_v31 = vpop.f32.mrf.mxu0 }
  0xd3   :  { %209 = vperm.xlu1 %2439, %v2842_v31  }
  0xd4   :  { %v2845_v32 = vpop.f32.mrf.mxu0 }
  0xd5   :  { %199 = vperm.xlu0 %2442, %v2845_v32  }
  0xd6   :  { %v2848_v33 = vpop.f32.mrf.mxu0 }
  0xd7   :  { %2440 = vset.pattern.permute.xlu1 %v2739_v34  ;;  %v2889_v46 = vpack.c.bf16 %v2848_v33, %v2842_v31 }
  0xd8   :  { %551 = vperm.xlu1 %2440, %v2842_v31   ;;  %v2852_v35 = vpop.f32.mrf.mxu0 }
  0xd9   :  { %2443 = vset.pattern.permute.xlu0 %v2740_v36  ;;  %v2911_v54 = vpack.c.bf16 %v2852_v35, %v2845_v32 }
  0xda   :  { %1215 = vperm.xlu0 %2443, %v2845_v32   ;;  %v2856_v37 = vpop.f32.mrf.mxu0 }
  0xdc   :  { %2441 = vset.pattern.permute.xlu1 %v2741_v38  ;;  %v2859_v39 = vpop.f32.mrf.mxu0 }
  0xdd   :  { %887 = vperm.xlu1 %2441, %v2842_v31  }
  0xde   :  { %2446 = vset.pattern.permute.xlu0 %v2738_v9  ;;  %v2863_v40 = vpop.f32.mrf.mxu0 }
  0xdf   :  { %v2867_v41 = vpack.c.bf16 %v2863_v40, %v2856_v37  ;;  %204 = vperm.xlu0 %2446, %v2852_v35  }
  0xe0   :  { %v2870_v43 = vpop.f32.mrf.mxu0 }
  0xe1   :  { %879 = vperm.xlu1 %2441, %v2845_v32   ;;  %2319 = vmatprep.subr.bf16.mxu0 %v2867_v41  ;;  %v2876_v44 = vpack.c.bf16 %v2870_v43, %v2859_v39 }
  0xe2   :  { %2351 = vmatprep.subr.bf16.mxu1 %v2867_v41  ;;  %2320 = vmatpush3.bf16.msra.mxu0 %v2867_v41 }
  0xe3   :  { %2352 = vmatpush3.bf16.msra.mxu1 %v2867_v41  ;;  %2448 = vset.pattern.permute.xlu0 %v2741_v38 }
  0xe4   :  { %883 = vperm.xlu0 %2448, %v2852_v35   ;;  %2321 = vmatprep.subr.bf16.mxu0 %v2876_v44 }
  0xe5   :  { %2444 = vset.pattern.permute.xlu1 %v2738_v9  ;;  %2353 = vmatprep.subr.bf16.mxu1 %v2876_v44 }
  0xe6   :  { %214 = vperm.xlu1 %2444, %v2848_v33   ;;  %2322 = vmatpush3.bf16.msra.mxu0 %v2876_v44  ;;  %v185_v50 = vpop.f32.mrf.mxu1 }
  0xe7   :  { %2354 = vmatpush3.bf16.msra.mxu1 %v2876_v44  ;;  %2323 = vmatprep.subr.bf16.mxu0 %v2889_v46  ;;  %v2905_v52 = vrot.slane %v185_v50, %v912_v47  ;;  %v2907_v53 = vrot.slane %v185_v50, %v1248_v48  ;;  %v2958_v60 = vrot.slane %v185_v50, %v4037_v59 }
  0xe8   :  { %2355 = vmatprep.subr.bf16.mxu1 %v2889_v46  ;;  %2449 = vset.pattern.permute.xlu0 %v2738_v9  ;;  %v2317_v55 = vpop.f32.mrf.mxu1  ;;  %v2968_v2 = vrot.slane %v185_v50, %v576_v62 }
  0xe9   :  { %229 = vperm.xlu0 %2449, %v2856_v37  }
  0xea   :  { %2445 = vset.pattern.permute.xlu1 %v2741_v38  ;;  %2324 = vmatpush3.bf16.msra.mxu0 %v2889_v46  ;;  %v188_v56 = vpop.f32.mrf.mxu1 }
  0xeb   :  { %2356 = vmatpush3.bf16.msra.mxu1 %v2889_v46  ;;  %891 = vperm.xlu1 %2445, %v2848_v33  }
  0xec   :  { %2325 = vmatprep.subr.bf16.mxu0 %v2911_v54  ;;  %2357 = vmatprep.subr.bf16.mxu1 %v2911_v54  ;;  %v2318_v58 = vpop.f32.mrf.mxu1 }
  0xed   :  { %219 = vperm.xlu0 %2449, %v2859_v39  }
  0xee   :  { %2326 = vmatpush3.bf16.msra.mxu0 %v2911_v54 }
  0xef   :  { %2358 = vmatpush3.bf16.msra.mxu1 %v2911_v54  ;;  %2447 = vset.pattern.permute.xlu1 %v2739_v34 }
  0xf0   :  { %2335 = vmatprep.subr.bf16.mxu0 %v2867_v41  ;;  %547 = vperm.xlu1 %2447, %v2852_v35  }
  0xf1   :  { %2452 = vset.pattern.permute.xlu0 %v2740_v36  ;;  %2383 = vmatprep.subr.bf16.mxu1 %v2920_v57 }
  0xf2   :  { %1227 = vperm.xlu0 %2452, %v2848_v33  }
  0xf4   :  { %567 = vperm.xlu1 %2447, %v2856_v37  }
  0xf6   :  { %1231 = vperm.xlu0 %2452, %v2859_v39  }
  0xf8   :  { %559 = vperm.xlu1 %2447, %v2859_v39  }
  0xfa   :  { %1243 = vperm.xlu0 %2452, %v2863_v40  }
  0xfc   :  { %2450 = vset.pattern.permute.xlu1 %v2738_v9 }
  0xfd   :  { %234 = vperm.xlu1 %2450, %v2863_v40  }
  0xfe   :  { %2455 = vset.pattern.permute.xlu0 %v2739_v34 }
  0xff   :  { %543 = vperm.xlu0 %2455, %v2845_v32  }
 0x101   :  { %224 = vperm.xlu1 %2450, %v2870_v43  }
 0x103   :  { %555 = vperm.xlu0 %2455, %v2848_v33  }
 0x105   :  { %2451 = vset.pattern.permute.xlu1 %v2740_v36 }
 0x106   :  { %1219 = vperm.xlu1 %2451, %v2852_v35  }
 0x107   :  { %571 = vperm.xlu0 %2455, %v2863_v40  }
 0x10a   :  { %1223 = vperm.xlu1 %2451, %v2842_v31  }
 0x10b   :  { %563 = vperm.xlu0 %2455, %v2870_v43  }
 0x10e   :  { %2453 = vset.pattern.permute.xlu1 %v2741_v38 }
 0x10f   :  { %2456 = vset.pattern.permute.xlu0 %v2741_v38  ;;  %895 = vperm.xlu1 %2453, %v2859_v39  }
 0x110   :  { %899 = vperm.xlu0 %2456, %v2870_v43  }
 0x113   :  { %903 = vperm.xlu1 %2453, %v2856_v37  }
 0x117   :  { %907 = vperm.xlu1 %2453, %v2863_v40  }
 0x11b   :  { %2454 = vset.pattern.permute.xlu1 %v2740_v36 }
 0x11c   :  { %1239 = vperm.xlu1 %2454, %v2856_v37  }
 0x120   :  { %1235 = vperm.xlu1 %2454, %v2870_v43  }
 0x14e   :  { %v210_v63 = vpop.permute.xlu1 %209 }
 0x14f   :  { %v243_v1 = vadd.f32 %v2958_v60, %v210_v63  ;;  %v27_v63 = vunpack.c.1.s8 %v2963_v61 }
 0x150   :  { %v200_v3 = vpop.permute.xlu0 %199 }
 0x151   :  { %v251_v6 = vmul.f32 0.2, %v243_v1  ;;  %v241_v7 = vadd.f32 %v2958_v60, %v200_v3  ;;  %vm3036_vm7 = vcmp.ne.s32.totalorder %v27_v63, 0 }
 0x153   :  { %v249_v9 = vmul.f32 0.2, %v241_v7  ;;  %v552_v10 = vpop.permute.xlu1 %551  ;;  %v259_v11 = vmax.f32 %v243_v1, %v251_v6 }
 0x154   :  { %v580_v12 = vadd.f32 %v2968_v2, %v552_v10 }
 0x155   :  { %v2981_v14 = vpop.permute.xlu0 %1215  ;;  %v2985_v15 = vsel %vm2972_vm3, %v259_v11, inf  ;;  %v257_v16 = vmax.f32 %v241_v7, %v249_v9  ;;  %v32_v7 = vunpack.c.2.s8 %v3032_v0 }
 0x156   :  { %v588_v17 = vmul.f32 0.2, %v580_v12  ;;  %v280_v18 = vsel %vm4042_vm4, %v2985_v15, inf }
 0x157   :  { %281 = vmin.xlane.f32.xlu0 %v280_v18  ;;  %v2991_v19 = vsel %vm2977_vm5, %v257_v16, inf  ;;  %vm3051_vm8 = vcmp.ne.s32.totalorder %v32_v7, 0 }
 0x158   :  { %v2993_v20 = vpop.permute.xlu1 %887  ;;  %v274_v21 = vsel %vm4042_vm4, %v2991_v19, inf  ;;  %v596_v22 = vmax.f32 %v580_v12, %v588_v17 }
 0x159   :  { %275 = vmin.xlane.f32.xlu1 %v274_v21 }
 0x15a   :  { %v205_v23 = vpop.permute.xlu0 %204  ;;  %v2999_v24 = vsel %vm2972_vm3, %v596_v22, inf }
 0x15b   :  { %v616_v25 = vsel %vm4042_vm4, %v2999_v24, inf  ;;  %v242_v49 = vadd.f32 %v2958_v60, %v205_v23 }
 0x15c   :  { %v880_v26 = vpop.permute.xlu1 %879  ;;  %617 = vmin.xlane.f32.xlu0 %v616_v25 }
 0x15d   :  { %v250_v55 = vmul.f32 0.2, %v242_v49 }
 0x15f   :  { %v3003_v27 = vpop.permute.xlu0 %883  ;;  %v258_v6 = vmax.f32 %v242_v49, %v250_v55 }
 0x161   :  { %v215_v28 = vpop.permute.xlu1 %214  ;;  %v3049_v25 = vsel %vm3036_vm7, %v258_v6, inf }
 0x162   :  { %v244_v30 = vadd.f32 %v2958_v60, %v215_v28  ;;  %v277_v55 = vsel %vm4042_vm4, %v3049_v25, inf }
 0x164   :  { %v252_v31 = vmul.f32 0.2, %v244_v30  ;;  %v230_v32 = vpop.permute.xlu0 %229 }
 0x165   :  { %v247_v56 = vadd.f32 %v2958_v60, %v230_v32 }
 0x166   :  { %v3011_v34 = vpop.permute.xlu1 %891  ;;  %v260_v35 = vmax.f32 %v244_v30, %v252_v31 }
 0x167   :  { %v255_v9 = vmul.f32 0.2, %v247_v56 }
 0x168   :  { %v220_v36 = vpop.permute.xlu0 %219  ;;  %v3015_v37 = vsel %vm3007_vm6, %v260_v35, inf }
 0x169   :  { %v283_v38 = vsel %vm4042_vm4, %v3015_v37, inf  ;;  %v245_v29 = vadd.f32 %v2958_v60, %v220_v36  ;;  %v263_v32 = vmax.f32 %v247_v56, %v255_v9 }
 0x16a   :  { %284 = vmin.xlane.f32.xlu1 %v283_v38 }
 0x16b   :  { %v548_v39 = vpop.permute.xlu1 %547  ;;  %v253_v63 = vmul.f32 0.2, %v245_v29 }
 0x16c   :  { %v579_v58 = vadd.f32 %v2968_v2, %v548_v39 }
 0x16d   :  { %v3019_v40 = vpop.permute.xlu0 %1227 }
 0x16e   :  { %v587_v10 = vmul.f32 0.2, %v579_v58 }
 0x16f   :  { %v568_v43 = vpop.permute.xlu1 %567 }
 0x170   :  { %v584_v61 = vadd.f32 %v2968_v2, %v568_v43  ;;  %v595_v35 = vmax.f32 %v579_v58, %v587_v10  ;;  %v30_v10 = vunpack.c.0.s8 %v3032_v0 }
 0x171   :  { %v3021_v47 = vpop.permute.xlu0 %1231 }
 0x172   :  { %v592_v38 = vmul.f32 0.2, %v584_v61  ;;  %vm3098_vm10 = vcmp.ne.s32.totalorder %v30_v10, 0 }
 0x173   :  { %v560_v48 = vpop.permute.xlu1 %559 }
 0x174   :  { %v600_v7 = vmax.f32 %v584_v61, %v592_v38  ;;  %v261_v61 = vmax.f32 %v245_v29, %v253_v63  ;;  %v916_v29 = vadd.f32 %v2905_v52, %v2993_v20  ;;  %v1250_v63 = vadd.f32 %v2907_v53, %v2981_v14 }
 0x175   :  { %v3024_v50 = vpop.permute.xlu0 %1243 }
 0x178   :  { %v235_v51 = vpop.permute.xlu1 %234 }
 0x179   :  { %v248_v16 = vadd.f32 %v2958_v60, %v235_v51  ;;  %v914_v51 = vadd.f32 %v2905_v52, %v880_v26  ;;  %v3075_v26 = vsel %vm3036_vm7, %v595_v35, inf  ;;  %v31_v35 = vunpack.c.1.s8 %v3032_v0 }
 0x17a   :  { %v544_v62 = vpop.permute.xlu0 %543 }
 0x17b   :  { %v578_v1 = vadd.f32 %v2968_v2, %v544_v62  ;;  %v256_v39 = vmul.f32 0.2, %v248_v16  ;;  %v33_v62 = vunpack.c.3.s8 %v3032_v0  ;;  %v3113_v0 = vsel %vm3098_vm10, %v261_v61, inf }
 0x17c   :  { %v225_v3 = vpop.permute.xlu1 %224  ;;  %vm3119_vm11 = vcmp.ne.s32.totalorder %v31_v35, 0  ;;  %v1258_v61 = vmul.f32 0.2, %v1250_v63 }
 0x17d   :  { %v586_v5 = vmul.f32 0.2, %v578_v1  ;;  %v264_v9 = vmax.f32 %v248_v16, %v256_v39  ;;  %vm3081_vm9 = vcmp.ne.s32.totalorder %v33_v62, 0 }
 0x17e   :  { %v556_v11 = vpop.permute.xlu0 %555 }
 0x17f   :  { %v581_v17 = vadd.f32 %v2968_v2, %v556_v11  ;;  %v594_v18 = vmax.f32 %v578_v1, %v586_v5  ;;  %v3071_v1 = vsel %vm3051_vm8, %v263_v32, inf  ;;  %v246_v5 = vadd.f32 %v2958_v60, %v225_v3 }
 0x180   :  { %v922_v11 = vmul.f32 0.2, %v914_v51  ;;  %v292_v60 = vsel %vm4042_vm4, %v3071_v1, inf  ;;  %v613_v3 = vsel %vm4042_vm4, %v3075_v26, inf }
 0x181   :  { %v589_v21 = vmul.f32 0.2, %v581_v17  ;;  %v1220_v22 = vpop.permute.xlu1 %1219  ;;  %v3045_v23 = vsel %vm2977_vm5, %v594_v18, inf  ;;  %v4056_v18 = vmov 0  ;;  %v254_v16 = vmul.f32 0.2, %v246_v5 }
 0x182   :  { %v572_v30 = vpop.permute.xlu0 %571  ;;  %v610_v31 = vsel %vm4042_vm4, %v3045_v23, inf  ;;  %v4057_v18 = vsel %vm3081_vm9, 4294967295, %v4056_v18  ;;  %v930_v38 = vmax.f32 %v914_v51, %v922_v11 }
 0x183   :  { %v585_v43 = vadd.f32 %v2968_v2, %v572_v30  ;;  %611 = vmin.xlane.f32.xlu0 %v610_v31  ;;  %v597_v49 = vmax.f32 %v581_v17, %v589_v21  ;;  %v915_v17 = vadd.f32 %v2905_v52, %v3003_v27  ;;  %4058 = vst [vmem:[#allocation2_spill] sm:$0xff] %v4057_v18  ;;  %v3092_v27 = vsel %vm3051_vm8, %v600_v7, inf }
 0x184   :  { %v582_v21 = vadd.f32 %v2968_v2, %v560_v48  ;;  %v3096_v31 = vsel %vm3081_vm9, %v264_v9, inf  ;;  %v262_v51 = vmax.f32 %v246_v5, %v254_v16  ;;  %v286_v9 = vsel %vm4042_vm4, %v3113_v0, inf }
 0x185   :  { %v3064_v36 = vsel %vm3007_vm6, %v597_v49, inf  ;;  %v1224_v56 = vpop.permute.xlu1 %1223  ;;  %v593_v6 = vmul.f32 0.2, %v585_v43  ;;  %v923_v39 = vmul.f32 0.2, %v915_v17  ;;  %v628_v49 = vsel %vm4042_vm4, %v3092_v27, inf }
 0x186   :  { %v619_v58 = vsel %vm4042_vm4, %v3064_v36, inf  ;;  %v590_v62 = vmul.f32 0.2, %v582_v21  ;;  %v3132_v5 = vsel %vm2977_vm5, %v930_v38, inf  ;;  %v3136_v14 = vsel %vm3119_vm11, %v262_v51, inf }
 0x187   :  { %278 = vmin.xlane.f32.xlu0 %v277_v55  ;;  %620 = vmin.xlane.f32.xlu1 %v619_v58  ;;  %v601_v30 = vmax.f32 %v585_v43, %v593_v6  ;;  %v917_v43 = vadd.f32 %v2905_v52, %v3011_v34  ;;  %v295_v55 = vsel %vm4042_vm4, %v3096_v31, inf  ;;  %v4061_v34 = vmov 0 }
 0x188   :  { %v4062_v34 = vsel %vm3119_vm11, 4294967295, %v4061_v34  ;;  %v924_v58 = vmul.f32 0.2, %v916_v29  ;;  %v1251_v6 = vadd.f32 %v2907_v53, %v1220_v22  ;;  %v931_v11 = vmax.f32 %v915_v17, %v923_v39 }
 0x189   :  { %v3117_v20 = vsel %vm3081_vm9, %v601_v30, inf  ;;  %v598_v22 = vmax.f32 %v582_v21, %v590_v62  ;;  %v946_v35 = vsel %vm4042_vm4, %v3132_v5, inf  ;;  %v289_v17 = vsel %vm4042_vm4, %v3136_v14, inf }
 0x18a   :  { %v896_v48 = vpop.permute.xlu1 %895  ;;  %v631_v10 = vsel %vm4042_vm4, %v3117_v20, inf  ;;  %v932_v16 = vmax.f32 %v916_v29, %v924_v58  ;;  %v1259_v30 = vmul.f32 0.2, %v1251_v6  ;;  %v3144_v39 = vsel %vm3036_vm7, %v931_v11, inf }
 0x18b   :  { %293 = vmin.xlane.f32.xlu0 %v292_v60  ;;  %614 = vmin.xlane.f32.xlu1 %v613_v3  ;;  %v925_v60 = vmul.f32 0.2, %v917_v43  ;;  %v564_v3 = vpop.permute.xlu0 %563  ;;  %v1252_v38 = vadd.f32 %v2907_v53, %v1224_v56  ;;  %v3150_v21 = vsel %vm3098_vm10, %v598_v22, inf  ;;  %v1253_v62 = vadd.f32 %v2907_v53, %v3019_v40 }
 0x18c   :  { %v1266_v51 = vmax.f32 %v1250_v63, %v1258_v61  ;;  %v622_v58 = vsel %vm4042_vm4, %v3150_v21, inf  ;;  %v949_v56 = vsel %vm4042_vm4, %v3144_v39, inf }
 0x18d   :  { %v933_v29 = vmax.f32 %v917_v43, %v925_v60  ;;  %v918_v43 = vadd.f32 %v2905_v52, %v896_v48  ;;  %v1261_v63 = vmul.f32 0.2, %v1253_v62 }
 0x18e   :  { %v904_v7 = vpop.permute.xlu1 %903  ;;  %v3169_v60 = vsel %vm2977_vm5, %v1266_v51, inf }
 0x18f   :  { %629 = vmin.xlane.f32.xlu0 %v628_v49  ;;  %296 = vmin.xlane.f32.xlu1 %v295_v55  ;;  %v583_v49 = vadd.f32 %v2968_v2, %v564_v3  ;;  %v3160_v2 = vsel %vm2972_vm3, %v932_v16, inf  ;;  %v3165_v40 = vsel %vm3007_vm6, %v933_v29, inf  ;;  %v920_v22 = vadd.f32 %v2905_v52, %v904_v7 }
 0x190   :  { %v955_v48 = vsel %vm4042_vm4, %v3165_v40, inf  ;;  %v1254_v7 = vadd.f32 %v2907_v53, %v3021_v47  ;;  %v1269_v51 = vmax.f32 %v1253_v62, %v1261_v63  ;;  %v1282_v59 = vsel %vm4042_vm4, %v3169_v60, inf }
 0x191   :  { %v591_v11 = vmul.f32 0.2, %v583_v49 }
 0x192   :  { %v908_v55 = vpop.permute.xlu1 %907  ;;  %v1262_v62 = vmul.f32 0.2, %v1254_v7 }
 0x193   :  { %287 = vmin.xlane.f32.xlu0 %v286_v9  ;;  %632 = vmin.xlane.f32.xlu1 %v631_v10  ;;  %v1267_v9 = vmax.f32 %v1251_v6, %v1259_v30  ;;  %v1260_v10 = vmul.f32 0.2, %v1252_v38  ;;  %v952_v6 = vsel %vm4042_vm4, %v3160_v2, inf  ;;  %v599_v16 = vmax.f32 %v583_v49, %v591_v11 }
 0x194   :  { %v926_v30 = vmul.f32 0.2, %v918_v43 }
 0x195   :  { %v3178_v61 = vsel %vm3036_vm7, %v1267_v9, inf  ;;  %v1268_v29 = vmax.f32 %v1252_v38, %v1260_v10  ;;  %v3194_v47 = vsel %vm3119_vm11, %v599_v16, inf  ;;  %v3198_v10 = vsel %vm3007_vm6, %v1269_v51, inf }
 0x196   :  { %v1285_v49 = vsel %vm4042_vm4, %v3178_v61, inf  ;;  %v934_v38 = vmax.f32 %v918_v43, %v926_v30  ;;  %v625_v63 = vsel %vm4042_vm4, %v3194_v47, inf }
 0x197   :  { %947 = vmin.xlane.f32.xlu0 %v946_v35  ;;  %290 = vmin.xlane.f32.xlu1 %v289_v17  ;;  %v1240_v3 = vpop.permute.xlu1 %1239  ;;  %v900_v35 = vpop.permute.xlu0 %899  ;;  %v921_v17 = vadd.f32 %v2905_v52, %v908_v55  ;;  %v3190_v55 = vsel %vm2972_vm3, %v1268_v29, inf  ;;  %v1257_v29 = vadd.f32 %v2907_v53, %v3024_v50 }
 0x198   :  { %v3208_v43 = vsel %vm3098_vm10, %v934_v38, inf }
 0x199   :  { %v929_v9 = vmul.f32 0.2, %v921_v17 }
 0x19b   :  { %623 = vmin.xlane.f32.xlu0 %v622_v58  ;;  %950 = vmin.xlane.f32.xlu1 %v949_v56  ;;  %v919_v58 = vadd.f32 %v2905_v52, %v900_v35  ;;  %v928_v56 = vmul.f32 0.2, %v920_v22  ;;  %v1236_v52 = vpop.permute.xlu1 %1235  ;;  %v937_v30 = vmax.f32 %v921_v17, %v929_v9  ;;  %v1291_v35 = vsel %vm4042_vm4, %v3198_v10, inf }
 0x19c   :  { %v1255_v16 = vadd.f32 %v2907_v53, %v1236_v52  ;;  %v1265_v9 = vmul.f32 0.2, %v1257_v29 }
 0x19d   :  { %v927_v11 = vmul.f32 0.2, %v919_v58  ;;  %v3222_v17 = vsel %vm3081_vm9, %v937_v30, inf }
 0x19e   :  { %v967_v50 = vsel %vm4042_vm4, %v3222_v17, inf  ;;  %v1273_v30 = vmax.f32 %v1257_v29, %v1265_v9 }
 0x19f   :  { %953 = vmin.xlane.f32.xlu0 %v952_v6  ;;  %956 = vmin.xlane.f32.xlu1 %v955_v48  ;;  %v936_v6 = vmax.f32 %v920_v22, %v928_v56  ;;  %v1256_v48 = vadd.f32 %v2907_v53, %v1240_v3  ;;  %v935_v51 = vmax.f32 %v919_v58, %v927_v11  ;;  %v958_v22 = vsel %vm4042_vm4, %v3208_v43, inf }
 0x1a0   :  { %v1270_v3 = vmax.f32 %v1254_v7, %v1262_v62 }
 0x1a1   :  { %v1264_v56 = vmul.f32 0.2, %v1256_v48  ;;  %v3218_v38 = vsel %vm3051_vm8, %v936_v6, inf  ;;  %v3234_v58 = vsel %vm3119_vm11, %v935_v51, inf }
 0x1a2   :  { %v964_v53 = vsel %vm4042_vm4, %v3218_v38, inf  ;;  %v3230_v7 = vsel %vm3098_vm10, %v1270_v3, inf }
 0x1a3   :  { %1283 = vmin.xlane.f32.xlu0 %v1282_v59  ;;  %1286 = vmin.xlane.f32.xlu1 %v1285_v49  ;;  %v1288_v59 = vsel %vm4042_vm4, %v3190_v55, inf  ;;  %v1263_v49 = vmul.f32 0.2, %v1255_v16  ;;  %v1272_v52 = vmax.f32 %v1256_v48, %v1264_v56  ;;  %v1294_v11 = vsel %vm4042_vm4, %v3230_v7, inf }
 0x1a5   :  { %v1271_v62 = vmax.f32 %v1255_v16, %v1263_v49 }
 0x1a7   :  { %1289 = vmin.xlane.f32.xlu0 %v1288_v59  ;;  %626 = vmin.xlane.f32.xlu1 %v625_v63  ;;  %v961_v59 = vsel %vm4042_vm4, %v3234_v58, inf  ;;  %v3242_v63 = vsel %vm3051_vm8, %v1272_v52, inf  ;;  %v3246_v6 = vsel %vm3119_vm11, %v1271_v62, inf }
 0x1a8   :  { %v1300_v48 = vsel %vm4042_vm4, %v3242_v63, inf  ;;  %v1297_v16 = vsel %vm4042_vm4, %v3246_v6, inf }
 0x1ab   :  { %959 = vmin.xlane.f32.xlu0 %v958_v22  ;;  %1292 = vmin.xlane.f32.xlu1 %v1291_v35  ;;  %v3254_v35 = vsel %vm3081_vm9, %v1273_v30, inf }
 0x1ac   :  { %v1303_v51 = vsel %vm4042_vm4, %v3254_v35, inf }
 0x1af   :  { %965 = vmin.xlane.f32.xlu0 %v964_v53  ;;  %968 = vmin.xlane.f32.xlu1 %v967_v50 }
 0x1b3   :  { %1295 = vmin.xlane.f32.xlu0 %v1294_v11  ;;  %962 = vmin.xlane.f32.xlu1 %v961_v59 }
 0x1b7   :  { %1301 = vmin.xlane.f32.xlu0 %v1300_v48  ;;  %1298 = vmin.xlane.f32.xlu1 %v1297_v16 }
 0x1bb   :  { %1304 = vmin.xlane.f32.xlu1 %v1303_v51 }
 0x1e0   :  { %v282_v3 = vpop.xlane.xlu0 %281 }
 0x1e1   :  { %vm300_vm14 = vcmp.eq.f32.partialorder %v282_v3, inf }
 0x1e2   :  { %v276_v22 = vpop.xlane.xlu1 %275  ;;  %v308_v50 = vsel %vm300_vm14, 0.0, %v282_v3 }
 0x1e3   :  { %vm298_vm13 = vcmp.eq.f32.partialorder %v276_v22, inf  ;;  %v316_v30 = vsub.f32 %v308_v50, %v2985_v15 }
 0x1e4   :  { %v306_v53 = vsel %vm298_vm13, 0.0, %v276_v22 }
 0x1e5   :  { %v618_v29 = vpop.xlane.xlu0 %617  ;;  %v314_v62 = vsub.f32 %v306_v53, %v2991_v19 }
 0x1e7   :  { %v322_v42 = vmul.f32 1.442695, %v314_v62 }
 0x1f3   :  { %v285_v56 = vpop.xlane.xlu1 %284 }
 0x1f4   :  { %vm301_vm12 = vcmp.eq.f32.partialorder %v285_v56, inf }
 0x1f5   :  { %v309_v49 = vsel %vm301_vm12, 0.0, %v285_v56  ;;  %v326_v56 = vmul.f32 1.442695, %v316_v30 }
 0x1f6   :  { %v317_v52 = vsub.f32 %v309_v49, %v3015_v37 }
 0x1f8   :  { %v328_v48 = vmul.f32 1.442695, %v317_v52 }
 0x1fa   :  { %2463 = vpow2.f32 %v328_v48 }
 0x20c   :  { %v612_v9 = vpop.xlane.xlu0 %611 }
 0x20d   :  { %vm634_vm0 = vcmp.eq.f32.partialorder %v612_v9, inf }
 0x20e   :  { %v642_v19 = vsel %vm634_vm0, 0.0, %v612_v9  ;;  %vm636_vm0 = vcmp.eq.f32.partialorder %v618_v29, inf }
 0x20f   :  { %v650_v49 = vsub.f32 %v642_v19, %v3045_v23  ;;  %v2464_v19 = vpop.eup %2463 }
 0x210   :  { %v279_v11 = vpop.xlane.xlu0 %278  ;;  %v621_v59 = vpop.xlane.xlu1 %620 }
 0x211   :  { %vm299_vm15 = vcmp.eq.f32.partialorder %v279_v11, inf  ;;  %vm637_vm14 = vcmp.eq.f32.partialorder %v621_v59, inf  ;;  %v658_v48 = vmul.f32 1.442695, %v650_v49 }
 0x212   :  { %v307_v16 = vsel %vm299_vm15, 0.0, %v279_v11  ;;  %v645_v11 = vsel %vm637_vm14, 0.0, %v621_v59 }
 0x213   :  { %v315_v51 = vsub.f32 %v307_v16, %v3049_v25 }
 0x214   :  { %v294_v4 = vpop.xlane.xlu0 %293  ;;  %v615_v18 = vpop.xlane.xlu1 %614 }
 0x215   :  { %v324_v22 = vmul.f32 1.442695, %v315_v51  ;;  %vm304_vm1 = vcmp.eq.f32.partialorder %v294_v4, inf  ;;  %vm635_vm12 = vcmp.eq.f32.partialorder %v615_v18, inf }
 0x216   :  { %v312_v3 = vsel %vm304_vm1, 0.0, %v294_v4  ;;  %v643_v25 = vsel %vm635_vm12, 0.0, %v615_v18  ;;  %v653_v18 = vsub.f32 %v645_v11, %v3064_v36 }
 0x217   :  { %2465 = vpow2.f32 %v324_v22  ;;  %v320_v50 = vsub.f32 %v312_v3, %v3071_v1  ;;  %v651_v30 = vsub.f32 %v643_v25, %v3075_v26 }
 0x218   :  { %2467 = vpow2.f32 %v322_v42  ;;  %v3262_v37 = vpop.xlane.xlu0 %629  ;;  %v297_v15 = vpop.xlane.xlu1 %296  ;;  %v664_v25 = vmul.f32 1.442695, %v653_v18 }
 0x219   :  { %2469 = vpow2.f32 %v326_v56  ;;  %vm305_vm13 = vcmp.eq.f32.partialorder %v297_v15, inf  ;;  %v334_v16 = vmul.f32 1.442695, %v320_v50  ;;  %v644_v56 = vsel %vm636_vm0, 0.0, %v618_v29 }
 0x21a   :  { %v313_v53 = vsel %vm305_vm13, 0.0, %v297_v15  ;;  %v660_v1 = vmul.f32 1.442695, %v651_v30  ;;  %2471 = vpow2.f32 %v658_v48  ;;  %v652_v36 = vsub.f32 %v644_v56, %v2999_v24 }
 0x21b   :  { %v321_v42 = vsub.f32 %v313_v53, %v3096_v31  ;;  %2473 = vpow2.f32 %v334_v16  ;;  %vm640_vm0 = vcmp.eq.f32.partialorder %v3262_v37, inf }
 0x21c   :  { %v288_v52 = vpop.xlane.xlu0 %287  ;;  %v633_v62 = vpop.xlane.xlu1 %632  ;;  %2475 = vpow2.f32 %v660_v1  ;;  %v662_v16 = vmul.f32 1.442695, %v652_v36  ;;  %v648_v1 = vsel %vm640_vm0, 0.0, %v3262_v37 }
 0x21d   :  { %vm302_vm15 = vcmp.eq.f32.partialorder %v288_v52, inf  ;;  %v336_v59 = vmul.f32 1.442695, %v321_v42  ;;  %vm641_vm13 = vcmp.eq.f32.partialorder %v633_v62, inf }
 0x21e   :  { %v310_v9 = vsel %vm302_vm15, 0.0, %v288_v52  ;;  %v649_v24 = vsel %vm641_vm13, 0.0, %v633_v62 }
 0x21f   :  { %v318_v4 = vsub.f32 %v310_v9, %v3113_v0  ;;  %2477 = vpow2.f32 %v336_v59 }
 0x220   :  { %v948_v23 = vpop.xlane.xlu0 %947  ;;  %v291_v51 = vpop.xlane.xlu1 %290 }
 0x221   :  { %vm970_vm1 = vcmp.eq.f32.partialorder %v948_v23, inf  ;;  %vm303_vm12 = vcmp.eq.f32.partialorder %v291_v51, inf  ;;  %v330_v15 = vmul.f32 1.442695, %v318_v4 }
 0x222   :  { %v978_v22 = vsel %vm970_vm1, 0.0, %v948_v23  ;;  %v311_v26 = vsel %vm303_vm12, 0.0, %v291_v51  ;;  %v657_v51 = vsub.f32 %v649_v24, %v3117_v20 }
 0x223   :  { %v986_v31 = vsub.f32 %v978_v22, %v3132_v5  ;;  %v319_v3 = vsub.f32 %v311_v26, %v3136_v14  ;;  %2479 = vpow2.f32 %v330_v15 }
 0x224   :  { %v2466_v0 = vpop.eup %2465  ;;  %v624_v49 = vpop.xlane.xlu0 %623 }
 0x225   :  { %v951_v29 = vpop.xlane.xlu1 %950  ;;  %v2468_v53 = vpop.eup %2467  ;;  %v332_v50 = vmul.f32 1.442695, %v319_v3  ;;  %vm638_vm15 = vcmp.eq.f32.partialorder %v624_v49, inf  ;;  %v994_v5 = vmul.f32 1.442695, %v986_v31  ;;  %v656_v3 = vsub.f32 %v648_v1, %v3092_v27 }
 0x226   :  { %vm971_vm14 = vcmp.eq.f32.partialorder %v951_v29, inf  ;;  %v2470_v52 = vpop.eup %2469  ;;  %v338_v30 = vpack.c.bf16 %v2466_v0, %v2468_v53  ;;  %v646_v4 = vsel %vm638_vm15, 0.0, %v624_v49 }
 0x227   :  { %v979_v11 = vsel %vm971_vm14, 0.0, %v951_v29  ;;  %v339_v42 = vpack.c.bf16 %v2464_v19, %v2470_v52  ;;  %2481 = vpow2.f32 %v332_v50  ;;  %v654_v59 = vsub.f32 %v646_v4, %v3150_v21  ;;  %v2472_v21 = vpop.eup %2471 }
 0x228   :  { %v987_v14 = vsub.f32 %v979_v11, %v3144_v39  ;;  %2327 = vmatprep.mubr.msk.bf16.mxu0 %vm4042_vm4, %v338_v30  ;;  %v954_v9 = vpop.xlane.xlu0 %953  ;;  %2483 = vpow2.f32 %v664_v25  ;;  %v2474_v49 = vpop.eup %2473  ;;  %v670_v11 = vmul.f32 1.442695, %v656_v3 }
 0x229   :  { %v957_v48 = vpop.xlane.xlu1 %956  ;;  %vm972_vm1 = vcmp.eq.f32.partialorder %v954_v9, inf  ;;  %2328 = vmatmul.mubr.msk.bf16.vlgmr.msra.gmra.mxu0 %vm4042_vm4, %v339_v42  ;;  %2485 = vpow2.f32 %v994_v5  ;;  %v666_v0 = vmul.f32 1.442695, %v654_v59  ;;  %v2476_v29 = vpop.eup %2475 }
 0x22a   :  { %v996_v18 = vmul.f32 1.442695, %v987_v14  ;;  %vm973_vm12 = vcmp.eq.f32.partialorder %v957_v48, inf  ;;  %v980_v23 = vsel %vm972_vm1, 0.0, %v954_v9  ;;  %2336 = vmatpush3.bf16.msra.mxu0 %v2867_v41 }
 0x22b   :  { %v981_v39 = vsel %vm973_vm12, 0.0, %v957_v48  ;;  %v988_v62 = vsub.f32 %v980_v23, %v3160_v2  ;;  %2337 = vmatprep.subr.bf16.mxu0 %v2876_v44 }
 0x22c   :  { %v989_v56 = vsub.f32 %v981_v39, %v3165_v40  ;;  %2487 = vpow2.f32 %v996_v18  ;;  %v1284_v22 = vpop.xlane.xlu0 %1283  ;;  %v672_v40 = vmul.f32 1.442695, %v657_v51 }
 0x22d   :  { %v1287_v26 = vpop.xlane.xlu1 %1286  ;;  %v998_v19 = vmul.f32 1.442695, %v988_v62  ;;  %vm1306_vm13 = vcmp.eq.f32.partialorder %v1284_v22, inf  ;;  %2489 = vpow2.f32 %v662_v16 }
 0x22e   :  { %v1000_v15 = vmul.f32 1.442695, %v989_v56  ;;  %vm1307_vm14 = vcmp.eq.f32.partialorder %v1287_v26, inf  ;;  %v1314_v20 = vsel %vm1306_vm13, 0.0, %v1284_v22  ;;  %2338 = vmatpush3.bf16.msra.mxu0 %v2876_v44  ;;  %v674_v56 = vpack.c.bf16 %v2476_v29, %v2472_v21 }
 0x22f   :  { %v1315_v2 = vsel %vm1307_vm14, 0.0, %v1287_v26  ;;  %2491 = vpow2.f32 %v998_v19  ;;  %v1322_v31 = vsub.f32 %v1314_v20, %v3169_v60  ;;  %2339 = vmatprep.subr.bf16.mxu0 %v2889_v46  ;;  %v2478_v60 = vpop.eup %2477 }
 0x230   :  { %v1323_v37 = vsub.f32 %v1315_v2, %v3178_v61  ;;  %2493 = vpow2.f32 %v1000_v15  ;;  %v1290_v36 = vpop.xlane.xlu0 %1289  ;;  %v2480_v27 = vpop.eup %2479  ;;  %v341_v16 = vpack.c.bf16 %v2478_v60, %v2474_v49 }
 0x231   :  { %v627_v25 = vpop.xlane.xlu1 %626  ;;  %v1330_v53 = vmul.f32 1.442695, %v1322_v31  ;;  %vm1308_vm0 = vcmp.eq.f32.partialorder %v1290_v36, inf  ;;  %2495 = vpow2.f32 %v672_v40 }
 0x232   :  { %vm639_vm15 = vcmp.eq.f32.partialorder %v627_v25, inf  ;;  %2340 = vmatpush3.bf16.msra.mxu0 %v2889_v46  ;;  %v1332_v61 = vmul.f32 1.442695, %v1323_v37  ;;  %2497 = vpow2.f32 %v666_v0  ;;  %v1316_v42 = vsel %vm1308_vm0, 0.0, %v1290_v36 }
 0x233   :  { %v647_v50 = vsel %vm639_vm15, 0.0, %v627_v25  ;;  %2341 = vmatprep.subr.bf16.mxu0 %v2911_v54  ;;  %2499 = vpow2.f32 %v1330_v53  ;;  %v1324_v39 = vsub.f32 %v1316_v42, %v3190_v55 }
 0x234   :  { %v655_v52 = vsub.f32 %v647_v50, %v3194_v47  ;;  %v960_v30 = vpop.xlane.xlu0 %959  ;;  %v2482_v14 = vpop.eup %2481  ;;  %2501 = vpow2.f32 %v1332_v61 }
 0x235   :  { %v1293_v5 = vpop.xlane.xlu1 %1292  ;;  %vm974_vm1 = vcmp.eq.f32.partialorder %v960_v30, inf  ;;  %v340_v4 = vpack.c.bf16 %v2482_v14, %v2480_v27  ;;  %v2484_v18 = vpop.eup %2483  ;;  %v1334_v40 = vmul.f32 1.442695, %v1324_v39 }
 0x236   :  { %v668_v24 = vmul.f32 1.442695, %v655_v52  ;;  %vm1309_vm12 = vcmp.eq.f32.partialorder %v1293_v5, inf  ;;  %v982_v9 = vsel %vm974_vm1, 0.0, %v960_v30  ;;  %2342 = vmatpush3.bf16.msra.mxu0 %v2911_v54  ;;  %v2486_v23 = vpop.eup %2485 }
 0x237   :  { %v1317_v48 = vsel %vm1309_vm12, 0.0, %v1293_v5  ;;  %2367 = vmatprep.subr.bf16.mxu0 %v2867_v41  ;;  %2331 = vmatprep.mubr.msk.bf16.mxu0 %vm4042_vm4, %v340_v4  ;;  %v990_v59 = vsub.f32 %v982_v9, %v3208_v43 }
 0x238   :  { %v1325_v47 = vsub.f32 %v1317_v48, %v3198_v10  ;;  %2503 = vpow2.f32 %v668_v24  ;;  %v966_v51 = vpop.xlane.xlu0 %965  ;;  %2332 = vmatmul.mubr.msk.bf16.gmra.mxu0 %vm4042_vm4, %v341_v16 }
 0x239   :  { %v969_v62 = vpop.xlane.xlu1 %968  ;;  %v2488_v1 = vpop.eup %2487  ;;  %2505 = vpow2.f32 %v670_v11  ;;  %vm976_vm13 = vcmp.eq.f32.partialorder %v966_v51, inf  ;;  %2343 = vmatprep.mubr.msk.bf16.mxu0 %vm4042_vm4, %v674_v56  ;;  %v1002_v21 = vmul.f32 1.442695, %v990_v59 }
 0x23a   :  { %vm977_vm14 = vcmp.eq.f32.partialorder %v969_v62, inf  ;;  %v984_v10 = vsel %vm976_vm13, 0.0, %v966_v51  ;;  %v1010_v26 = vpack.c.bf16 %v2488_v1, %v2486_v23  ;;  %v2490_v55 = vpop.eup %2489  ;;  %v1336_v19 = vmul.f32 1.442695, %v1325_v47 }
 0x23b   :  { %v985_v22 = vsel %vm977_vm14, 0.0, %v969_v62  ;;  %v992_v15 = vsub.f32 %v984_v10, %v3218_v38  ;;  %v675_v3 = vpack.c.bf16 %v2484_v18, %v2490_v55  ;;  %v4063_v51 = vmov 0.0  }
 0x23c   :  { %v993_v20 = vsub.f32 %v985_v22, %v3222_v17  ;;  %v2492_v2 = vpop.eup %2491  ;;  %2359 = vmatprep.mubr.msk.bf16.mxu1 %vm4042_vm4, %v1010_v26  ;;  %v1296_v43 = vpop.xlane.xlu0 %1295  ;;  %2507 = vpow2.f32 %v1336_v19  ;;  %v2742_v19 = vmov 64  }
 0x23d   :  { %v963_v31 = vpop.xlane.xlu1 %962  ;;  %v2494_v37 = vpop.eup %2493  ;;  %vm1310_vm15 = vcmp.eq.f32.partialorder %v1296_v43, inf  ;;  %v1006_v0 = vmul.f32 1.442695, %v992_v15  ;;  %2509 = vpow2.f32 %v1334_v40  ;;  %2457 = vset.pattern.permute.xlu1 %v2742_v19  ;;  %2458 = vset.pattern.permute.xlu0 %v2742_v19 }
 0x23e   :  { %vm975_vm0 = vcmp.eq.f32.partialorder %v963_v31, inf  ;;  %v1318_v36 = vsel %vm1310_vm15, 0.0, %v1296_v43  ;;  %v1011_v49 = vpack.c.bf16 %v2494_v37, %v2492_v2  ;;  %v1008_v29 = vmul.f32 1.442695, %v993_v20  ;;  %v2496_v53 = vpop.eup %2495 }
 0x23f   :  { %v983_v25 = vsel %vm975_vm0, 0.0, %v963_v31  ;;  %v1326_v38 = vsub.f32 %v1318_v36, %v3230_v7  ;;  %v2498_v61 = vpop.eup %2497  ;;  %2511 = vpow2.f32 %v1002_v21 }
 0x240   :  { %v991_v17 = vsub.f32 %v983_v25, %v3234_v58  ;;  %2360 = vmatmul.mubr.msk.bf16.vlgmr.msra.gmra.mxu1 %vm4042_vm4, %v1011_v49  ;;  %v1302_v50 = vpop.xlane.xlu0 %1301  ;;  %2344 = vmatmul.mubr.msk.bf16.vlgmr.msra.gmra.mxu0 %vm4042_vm4, %v675_v3  ;;  %2513 = vpow2.f32 %v1006_v0  ;;  %v2500_v58 = vpop.eup %2499 }
 0x241   :  { %v1299_v60 = vpop.xlane.xlu1 %1298  ;;  %vm1312_vm1 = vcmp.eq.f32.partialorder %v1302_v50, inf  ;;  %2384 = vmatpush3.bf16.msra.mxu1 %v2920_v57  ;;  %2368 = vmatpush3.bf16.msra.mxu0 %v2867_v41  ;;  %2515 = vpow2.f32 %v1008_v29  ;;  %v1338_v11 = vmul.f32 1.442695, %v1326_v38  ;;  %v2502_v14 = vpop.eup %2501 }
 0x242   :  { %v1004_v52 = vmul.f32 1.442695, %v991_v17  ;;  %vm1311_vm12 = vcmp.eq.f32.partialorder %v1299_v60, inf  ;;  %v1320_v27 = vsel %vm1312_vm1, 0.0, %v1302_v50  ;;  %2369 = vmatprep.subr.bf16.mxu0 %v2876_v44 }
 0x243   :  { %v1319_v7 = vsel %vm1311_vm12, 0.0, %v1299_v60  ;;  %v1328_v30 = vsub.f32 %v1320_v27, %v3242_v63 }
 0x244   :  { %v1327_v5 = vsub.f32 %v1319_v7, %v3246_v6  ;;  %2517 = vpow2.f32 %v1004_v52  ;;  %v1346_v6 = vpack.c.bf16 %v2502_v14, %v2500_v58 }
 0x245   :  { %v1305_v42 = vpop.xlane.xlu1 %1304  ;;  %v2504_v24 = vpop.eup %2503  ;;  %v1342_v48 = vmul.f32 1.442695, %v1328_v30  ;;  %2370 = vmatpush3.bf16.msra.mxu0 %v2876_v44  ;;  %2519 = vpow2.f32 %v1338_v11 }
 0x246   :  { %v1340_v9 = vmul.f32 1.442695, %v1327_v5  ;;  %vm1313_vm13 = vcmp.eq.f32.partialorder %v1305_v42, inf  ;;  %v2506_v57 = vpop.eup %2505  ;;  %v676_v4 = vpack.c.bf16 %v2504_v24, %v2498_v61  ;;  %2371 = vmatprep.subr.bf16.mxu0 %v2889_v46 }
 0x247   :  { %v1321_v41 = vsel %vm1313_vm13, 0.0, %v1305_v42  ;;  %v677_v63 = vpack.c.bf16 %v2496_v53, %v2506_v57 }
 0x248   :  { %v1329_v18 = vsub.f32 %v1321_v41, %v3254_v35  ;;  %2521 = vpow2.f32 %v1340_v9  ;;  %2347 = vmatprep.mubr.msk.bf16.mxu0 %vm4042_vm4, %v676_v4 }
 0x249   :  { %2348 = vmatmul.mubr.msk.bf16.gmra.mxu0 %vm4042_vm4, %v677_v63  ;;  %2523 = vpow2.f32 %v1342_v48  ;;  %v2508_v44 = vpop.eup %2507 }
 0x24a   :  { %v1344_v47 = vmul.f32 1.442695, %v1329_v18  ;;  %2372 = vmatpush3.bf16.msra.mxu0 %v2889_v46  ;;  %2375 = vmatprep.mubr.msk.bf16.mxu0 %vm4042_vm4, %v1346_v6  ;;  %v2510_v35 = vpop.eup %2509 }
 0x24b   :  { %2373 = vmatprep.subr.bf16.mxu0 %v2911_v54  ;;  %v1347_v39 = vpack.c.bf16 %v2508_v44, %v2510_v35 }
 0x24c   :  { %2525 = vpow2.f32 %v1344_v47  ;;  %v2512_v16 = vpop.eup %2511 }
 0x24d   :  { %v2514_v23 = vpop.eup %2513 }
 0x24e   :  { %2374 = vmatpush3.bf16.msra.mxu0 %v2911_v54  ;;  %v2516_v62 = vpop.eup %2515 }
 0x24f   :  { %2401 = vmatprep.subr.bf16.mxu0 %v4063_v51  ;;  %v1013_v46 = vpack.c.bf16 %v2516_v62, %v2514_v23 }
 0x251   :  { %v2518_v56 = vpop.eup %2517  ;;  %2376 = vmatmul.mubr.msk.bf16.vlgmr.msra.gmra.mxu0 %vm4042_vm4, %v1347_v39 }
 0x252   :  { %v1012_v1 = vpack.c.bf16 %v2518_v56, %v2512_v16  ;;  %v2520_v59 = vpop.eup %2519 }
 0x254   :  { %2363 = vmatprep.mubr.msk.bf16.mxu1 %vm4042_vm4, %v1012_v1 }
 0x255   :  { %v2522_v10 = vpop.eup %2521  ;;  %2364 = vmatmul.mubr.msk.bf16.gmra.mxu1 %vm4042_vm4, %v1013_v46 }
 0x256   :  { %v1348_v22 = vpack.c.bf16 %v2522_v10, %v2520_v59  ;;  %v2524_v26 = vpop.eup %2523 }
 0x258   :  { %2379 = vmatprep.mubr.msk.bf16.mxu0 %vm4042_vm4, %v1348_v22 }
 0x259   :  { %v2526_v55 = vpop.eup %2525 }
 0x25a   :  { %v1349_v54 = vpack.c.bf16 %v2526_v55, %v2524_v26 }
 0x25c   :  { %2380 = vmatmul.mubr.msk.bf16.gmra.mxu0 %vm4042_vm4, %v1349_v54 }
 0x25d   :  { %2409 = vmatprep.mubr.msk.bf16.mxu0 %vm2737_vm2, %v4063_v51 }
 0x2e9   :  { %v3331_v15 = vpop.f32.mrf.mxu0 }
 0x2ea   :  { %vm421_vm14 = vcmp.gt.f32.partialorder %v3331_v15, 0.0 }
 0x2eb   :  { %v429_v20 = vsel %vm421_vm14, %v3331_v15, 1.0  ;;  %v3335_v2 = vpop.f32.mrf.mxu0 }
 0x2ec   :  { %2527 = vrcp.f32 %v429_v20  ;;  %vm419_vm15 = vcmp.gt.f32.partialorder %v3335_v2, 0.0 }
 0x2ed   :  { %v427_v40 = vsel %vm419_vm15, %v3335_v2, 1.0  ;;  %v3339_v43 = vpop.f32.mrf.mxu0 }
 0x2ee   :  { %2529 = vrcp.f32 %v427_v40  ;;  %vm422_vm1 = vcmp.gt.f32.partialorder %v3339_v43, 0.0 }
 0x2ef   :  { %v3341_v31 = vpop.f32.mrf.mxu0  ;;  %v430_v7 = vsel %vm422_vm1, %v3339_v43, 1.0 }
 0x2f0   :  { %vm420_vm14 = vcmp.gt.f32.partialorder %v3341_v31, 0.0 }
 0x2f1   :  { %v428_v5 = vsel %vm420_vm14, %v3341_v31, 1.0 }
 0x2f8   :  { %v3343_v21 = vpop.f32.mrf.mxu0 }
 0x2f9   :  { %v2528_v37 = vpop.eup %2527 }
 0x2fa   :  { %455 = vperm.xlu1 %2457, %v2528_v37   ;;  %v3345_v0 = vpop.f32.mrf.mxu0 }
 0x2fb   :  { %v2530_v3 = vpop.eup %2529  ;;  %vm423_vm1 = vcmp.gt.f32.partialorder %v3345_v0, 0.0 }
 0x2fc   :  { %445 = vperm.xlu0 %2458, %v2530_v3   ;;  %v3347_v36 = vpop.f32.mrf.mxu0  ;;  %v431_v6 = vsel %vm423_vm1, %v3345_v0, 1.0 }
 0x2fd   :  { %vm426_vm15 = vcmp.gt.f32.partialorder %v3347_v36, 0.0 }
 0x2fe   :  { %v3349_v25 = vpop.f32.mrf.mxu0  ;;  %v434_v42 = vsel %vm426_vm15, %v3347_v36, 1.0 }
 0x300   :  { %v3351_v49 = vpop.f32.mrf.mxu1  ;;  %v3354_v29 = vpop.f32.mrf.mxu0 }
 0x301   :  { %vm1093_vm2 = vcmp.gt.f32.partialorder %v3351_v49, 0.0 }
 0x302   :  { %v1101_v38 = vsel %vm1093_vm2, %v3351_v49, 1.0  ;;  %v3357_v17 = vpop.f32.mrf.mxu1  ;;  %v3360_v53 = vpop.f32.mrf.mxu0  ;;  %vm425_vm2 = vcmp.gt.f32.partialorder %v3343_v21, 0.0 }
 0x303   :  { %2531 = vrcp.f32 %v1101_v38  ;;  %vm1091_vm0 = vcmp.gt.f32.partialorder %v3357_v17, 0.0  ;;  %v433_v9 = vsel %vm425_vm2, %v3343_v21, 1.0  ;;  %vm755_vm2 = vcmp.gt.f32.partialorder %v3360_v53, 0.0 }
 0x304   :  { %v1099_v50 = vsel %vm1091_vm0, %v3357_v17, 1.0  ;;  %v3364_v60 = vpop.f32.mrf.mxu1  ;;  %v3367_v61 = vpop.f32.mrf.mxu0  ;;  %vm424_vm0 = vcmp.gt.f32.partialorder %v3349_v25, 0.0  ;;  %v763_v20 = vsel %vm755_vm2, %v3360_v53, 1.0 }
 0x305   :  { %vm1094_vm12 = vcmp.gt.f32.partialorder %v3364_v60, 0.0  ;;  %2533 = vrcp.f32 %v1099_v50  ;;  %v432_v41 = vsel %vm424_vm0, %v3349_v25, 1.0  ;;  %vm758_vm1 = vcmp.gt.f32.partialorder %v3367_v61, 0.0 }
 0x306   :  { %v1102_v52 = vsel %vm1094_vm12, %v3364_v60, 1.0  ;;  %v3370_v27 = vpop.f32.mrf.mxu1  ;;  %v3374_v58 = vpop.f32.mrf.mxu0  ;;  %v766_v38 = vsel %vm758_vm1, %v3367_v61, 1.0 }
 0x307   :  { %2535 = vrcp.f32 %v1102_v52  ;;  %vm1092_vm13 = vcmp.gt.f32.partialorder %v3370_v27, 0.0 }
 0x308   :  { %v1100_v11 = vsel %vm1092_vm13, %v3370_v27, 1.0  ;;  %2537 = vrcp.f32 %v430_v7  ;;  %vm757_vm13 = vcmp.gt.f32.partialorder %v3354_v29, 0.0 }
 0x309   :  { %v3379_v30 = vpop.f32.mrf.mxu0  ;;  %2539 = vrcp.f32 %v1100_v11  ;;  %v765_v10 = vsel %vm757_vm13, %v3354_v29, 1.0  ;;  %vm756_vm13 = vcmp.gt.f32.partialorder %v3374_v58, 0.0 }
 0x30a   :  { %2541 = vrcp.f32 %v428_v5  ;;  %v764_v11 = vsel %vm756_vm13, %v3374_v58, 1.0 }
 0x30b   :  { %v3382_v14 = vpop.f32.mrf.mxu0  ;;  %2543 = vrcp.f32 %v434_v42 }
 0x30c   :  { %2545 = vrcp.f32 %v433_v9 }
 0x30d   :  { %v3387_v24 = vpop.f32.mrf.mxu0  ;;  %2547 = vrcp.f32 %v432_v41 }
 0x30e   :  { %2549 = vrcp.f32 %v431_v6  ;;  %vm762_vm14 = vcmp.gt.f32.partialorder %v3387_v24, 0.0 }
 0x30f   :  { %v3390_v57 = vpop.f32.mrf.mxu0  ;;  %v770_v55 = vsel %vm762_vm14, %v3387_v24, 1.0 }
 0x310   :  { %v2532_v48 = vpop.eup %2531  ;;  %vm760_vm0 = vcmp.gt.f32.partialorder %v3390_v57, 0.0 }
 0x311   :  { %1127 = vperm.xlu1 %2457, %v2532_v48   ;;  %v3394_v18 = vpop.f32.mrf.mxu0  ;;  %v768_v37 = vsel %vm760_vm0, %v3390_v57, 1.0  ;;  %vm759_vm0 = vcmp.gt.f32.partialorder %v3382_v14, 0.0 }
 0x312   :  { %v2534_v4 = vpop.eup %2533 }
 0x313   :  { %v3399_v35 = vpop.f32.mrf.mxu0 }
 0x314   :  { %v2536_v63 = vpop.eup %2535 }
 0x315   :  { %1117 = vperm.xlu1 %2457, %v2534_v4   ;;  %1132 = vperm.xlu0 %2458, %v2536_v63   ;;  %v3397_v47 = vpop.f32.mrf.mxu1  ;;  %v2538_v44 = vpop.eup %2537 }
 0x316   :  { %v2540_v23 = vpop.eup %2539  ;;  %v3408_v1 = vpop.f32.mrf.mxu0 }
 0x317   :  { %v3401_v16 = vpop.f32.mrf.mxu1  ;;  %v2542_v56 = vpop.eup %2541 }
 0x318   :  { %vm1095_vm12 = vcmp.gt.f32.partialorder %v3401_v16, 0.0  ;;  %v2544_v59 = vpop.eup %2543  ;;  %v3418_v54 = vpop.f32.mrf.mxu0 }
 0x319   :  { %v1103_v39 = vsel %vm1095_vm12, %v3401_v16, 1.0  ;;  %460 = vperm.xlu1 %2457, %v2538_v44   ;;  %1122 = vperm.xlu0 %2458, %v2540_v23   ;;  %v3406_v62 = vpop.f32.mrf.mxu1  ;;  %v2546_v26 = vpop.eup %2545  ;;  %vm1430_vm12 = vcmp.gt.f32.partialorder %v3408_v1, 0.0  ;;  %vm1428_vm14 = vcmp.gt.f32.partialorder %v3418_v54, 0.0  ;;  %v767_v23 = vsel %vm759_vm0, %v3382_v14, 1.0 }
 0x31a   :  { %2551 = vrcp.f32 %v1103_v39  ;;  %v2548_v19 = vpop.eup %2547  ;;  %v1438_v7 = vsel %vm1430_vm12, %v3408_v1, 1.0  ;;  %v1436_v9 = vsel %vm1428_vm14, %v3418_v54, 1.0  ;;  %vm1098_vm2 = vcmp.gt.f32.partialorder %v3406_v62, 0.0 }
 0x31b   :  { %v3410_v46 = vpop.f32.mrf.mxu1  ;;  %v2550_v3 = vpop.eup %2549  ;;  %v1106_v6 = vsel %vm1098_vm2, %v3406_v62, 1.0  ;;  %vm1429_vm12 = vcmp.gt.f32.partialorder %v3394_v18, 0.0  ;;  %vm1427_vm14 = vcmp.gt.f32.partialorder %v3399_v35, 0.0 }
 0x31c   :  { %vm1096_vm15 = vcmp.gt.f32.partialorder %v3410_v46, 0.0  ;;  %v3423_v40 = vpop.f32.mrf.mxu0 }
 0x31d   :  { %v1104_v22 = vsel %vm1096_vm15, %v3410_v46, 1.0  ;;  %450 = vperm.xlu1 %2457, %v2542_v56   ;;  %480 = vperm.xlu0 %2458, %v2544_v59   ;;  %vm761_vm15 = vcmp.gt.f32.partialorder %v3379_v30, 0.0  ;;  %vm1433_vm0 = vcmp.gt.f32.partialorder %v3423_v40, 0.0 }
 0x31e   :  { %2553 = vrcp.f32 %v1104_v22  ;;  %v3429_v50 = vpop.f32.mrf.mxu0  ;;  %v769_v41 = vsel %vm761_vm15, %v3379_v30, 1.0  ;;  %vm1097_vm15 = vcmp.gt.f32.partialorder %v3397_v47, 0.0 }
 0x31f   :  { %2555 = vrcp.f32 %v765_v10  ;;  %v1437_v10 = vsel %vm1429_vm12, %v3394_v18, 1.0  ;;  %vm1431_vm2 = vcmp.gt.f32.partialorder %v3429_v50, 0.0 }
 0x320   :  { %2557 = vrcp.f32 %v770_v55  ;;  %v3435_v5 = vpop.f32.mrf.mxu0 }
 0x321   :  { %475 = vperm.xlu1 %2457, %v2546_v26   ;;  %470 = vperm.xlu0 %2458, %v2548_v19   ;;  %2559 = vrcp.f32 %v763_v20  ;;  %vm1434_vm13 = vcmp.gt.f32.partialorder %v3435_v5, 0.0  ;;  %v1435_v19 = vsel %vm1427_vm14, %v3399_v35, 1.0 }
 0x322   :  { %2561 = vrcp.f32 %v768_v37  ;;  %v3441_v4 = vpop.f32.mrf.mxu0  ;;  %v1442_v26 = vsel %vm1434_vm13, %v3435_v5, 1.0 }
 0x323   :  { %2563 = vrcp.f32 %v766_v38  ;;  %vm1432_vm1 = vcmp.gt.f32.partialorder %v3441_v4, 0.0 }
 0x324   :  { %2565 = vrcp.f32 %v1438_v7  ;;  %v1440_v56 = vsel %vm1432_vm1, %v3441_v4, 1.0  ;;  %v1439_v7 = vsel %vm1431_vm2, %v3429_v50, 1.0 }
 0x325   :  { %465 = vperm.xlu1 %2457, %v2550_v3   ;;  %2567 = vrcp.f32 %v764_v11  ;;  %v1105_v3 = vsel %vm1097_vm15, %v3397_v47, 1.0 }
 0x326   :  { %2569 = vrcp.f32 %v1436_v9  ;;  %v1441_v9 = vsel %vm1433_vm0, %v3423_v40, 1.0 }
 0x327   :  { %v2552_v52 = vpop.eup %2551  ;;  %2571 = vrcp.f32 %v769_v41 }
 0x328   :  { %2573 = vrcp.f32 %v1106_v6  ;;  %v1569_v6 = vld [vmem:[%s4033_s4 + $0x30] sm:$0xff] }
 0x329   :  { %1137 = vperm.xlu1 %2457, %v2552_v52   ;;  %2575 = vrcp.f32 %v767_v23 }
 0x32a   :  { %2577 = vrcp.f32 %v1440_v56  ;;  %v1567_v56 = vld [vmem:[%s4033_s4 + $0x20] sm:$0xff] }
 0x32b   :  { %v2554_v42 = vpop.eup %2553  ;;  %2579 = vrcp.f32 %v1437_v10 }
 0x32c   :  { %v2556_v48 = vpop.eup %2555  ;;  %1142 = vperm.xlu0 %2458, %v2554_v42   ;;  %2581 = vrcp.f32 %v1442_v26  ;;  %v1565_v26 = vld [vmem:[%s4033_s4 + $0x10] sm:$0xff] }
 0x32d   :  { %791 = vperm.xlu1 %2457, %v2556_v48   ;;  %v2558_v63 = vpop.eup %2557  ;;  %2583 = vrcp.f32 %v1435_v19 }
 0x32e   :  { %v2560_v44 = vpop.eup %2559  ;;  %2585 = vrcp.f32 %v1105_v3 }
 0x32f   :  { %v2562_v39 = vpop.eup %2561  ;;  %2587 = vrcp.f32 %v1439_v7 }
 0x330   :  { %816 = vperm.xlu0 %2458, %v2558_v63   ;;  %v2564_v59 = vpop.eup %2563  ;;  %2589 = vrcp.f32 %v1441_v9 }
 0x331   :  { %781 = vperm.xlu1 %2457, %v2560_v44   ;;  %v2566_v22 = vpop.eup %2565  ;;  %v1570_v44 = vld [vmem:[%s4033_s4 + $0x38] sm:$0xff] }
 0x332   :  { %v2568_v55 = vpop.eup %2567  ;;  %v1575_v23 = vpack.c.bf16 %v1570_v44, %v1569_v6 }
 0x333   :  { %v2570_v20 = vpop.eup %2569 }
 0x334   :  { %806 = vperm.xlu0 %2458, %v2562_v39   ;;  %v2572_v37 = vpop.eup %2571  ;;  %2385 = vmatprep.subr.bf16.mxu1 %v1575_v23 }
 0x335   :  { %796 = vperm.xlu1 %2457, %v2564_v59   ;;  %v2574_v38 = vpop.eup %2573  ;;  %2386 = vmatpush3.bf16.msra.mxu1 %v1575_v23  ;;  %v1568_v59 = vld [vmem:[%s4033_s4 + $0x28] sm:$0xff] }
 0x336   :  { %v2576_v52 = vpop.eup %2575  ;;  %v1574_v10 = vpack.c.bf16 %v1568_v59, %v1567_v56 }
 0x337   :  { %v2578_v11 = vpop.eup %2577 }
 0x338   :  { %1468 = vperm.xlu0 %2458, %v2566_v22   ;;  %v2580_v42 = vpop.eup %2579  ;;  %2387 = vmatprep.subr.bf16.mxu1 %v1574_v10 }
 0x339   :  { %786 = vperm.xlu1 %2457, %v2568_v55   ;;  %v2582_v48 = vpop.eup %2581  ;;  %2388 = vmatpush3.bf16.msra.mxu1 %v1574_v10  ;;  %v1566_v55 = vld [vmem:[%s4033_s4 + $0x18] sm:$0xff] }
 0x33a   :  { %v2584_v41 = vpop.eup %2583  ;;  %v1573_v19 = vpack.c.bf16 %v1566_v55, %v1565_v26 }
 0x33b   :  { %v2586_v63 = vpop.eup %2585 }
 0x33c   :  { %1458 = vperm.xlu0 %2458, %v2570_v20   ;;  %v2588_v39 = vpop.eup %2587  ;;  %2389 = vmatprep.subr.bf16.mxu1 %v1573_v19  ;;  %v1563_v20 = vld [vmem:[%s4033_s4] sm:$0xff] }
 0x33d   :  { %811 = vperm.xlu1 %2457, %v2572_v37   ;;  %v2590_v22 = vpop.eup %2589  ;;  %2390 = vmatpush3.bf16.msra.mxu1 %v1573_v19  ;;  %v1564_v37 = vld [vmem:[%s4033_s4 + $0x8] sm:$0xff] }
 0x33e   :  { %v1572_v3 = vpack.c.bf16 %v1564_v37, %v1563_v20 }
 0x340   :  { %1152 = vperm.xlu0 %2458, %v2574_v38   ;;  %2391 = vmatprep.subr.bf16.mxu1 %v1572_v3 }
 0x341   :  { %801 = vperm.xlu1 %2457, %v2576_v52   ;;  %2392 = vmatpush3.bf16.msra.mxu1 %v1572_v3 }
 0x344   :  { %1478 = vperm.xlu0 %2458, %v2578_v11  }
 0x345   :  { %1463 = vperm.xlu1 %2457, %v2580_v42  }
 0x348   :  { %1488 = vperm.xlu0 %2458, %v2582_v48  }
 0x349   :  { %1453 = vperm.xlu1 %2457, %v2584_v41  }
 0x34d   :  { %1147 = vperm.xlu1 %2457, %v2586_v63  }
 0x351   :  { %1473 = vperm.xlu1 %2457, %v2588_v39  }
 0x355   :  { %1483 = vperm.xlu1 %2457, %v2590_v22  }
 0x375   :  { %v456_v38 = vpop.permute.xlu1 %455 }
 0x376   :  { %v485_v63 = vmul.f32 %v3331_v15, %v456_v38 }
 0x377   :  { %v446_v7 = vpop.permute.xlu0 %445 }
 0x378   :  { %v3485_v44 = vmul.f32 %v446_v7, %v3335_v2  ;;  %v503_v39 = vmul.f32 1.442695, %v485_v63  ;;  %vm493_vm12 = vcmp.gt.f32.partialorder %v485_v63, 0.0 }
 0x37a   :  { %v499_v59 = vmul.f32 1.442695, %v3485_v44  ;;  %2591 = vpow2.f32 %v503_v39  ;;  %vm491_vm13 = vcmp.gt.f32.partialorder %v3485_v44, 0.0 }
 0x37c   :  { %2593 = vpow2.f32 %v499_v59 }
 0x387   :  { %v2592_v59 = vpop.eup %2591 }
 0x38c   :  { %v1128_v52 = vpop.permute.xlu1 %1127 }
 0x38d   :  { %v3489_v26 = vmul.f32 %v3351_v49, %v1128_v52 }
 0x38f   :  { %v1175_v2 = vmul.f32 1.442695, %v3489_v26  ;;  %vm1165_vm14 = vcmp.gt.f32.partialorder %v3489_v26, 0.0 }
 0x390   :  { %v1118_v11 = vpop.permute.xlu1 %1117  ;;  %v1133_v42 = vpop.permute.xlu0 %1132 }
 0x391   :  { %v3496_v20 = vmul.f32 %v1118_v11, %v3357_v17  ;;  %v3499_v37 = vmul.f32 %v3364_v60, %v1133_v42  ;;  %2595 = vpow2.f32 %v1175_v2 }
 0x393   :  { %v1177_v7 = vmul.f32 1.442695, %v3499_v37  ;;  %vm1163_vm15 = vcmp.gt.f32.partialorder %v3496_v20, 0.0  ;;  %vm1166_vm2 = vcmp.gt.f32.partialorder %v3499_v37, 0.0 }
 0x394   :  { %v461_v9 = vpop.permute.xlu1 %460  ;;  %v1123_v48 = vpop.permute.xlu0 %1122 }
 0x395   :  { %v3492_v55 = vmul.f32 %v3339_v43, %v461_v9  ;;  %v1171_v43 = vmul.f32 1.442695, %v3496_v20  ;;  %v3510_v17 = vmul.f32 %v1123_v48, %v3370_v27  ;;  %v2594_v27 = vpop.eup %2593 }
 0x397   :  { %v505_v3 = vmul.f32 1.442695, %v3492_v55  ;;  %v1173_v48 = vmul.f32 1.442695, %v3510_v17  ;;  %vm494_vm0 = vcmp.gt.f32.partialorder %v3492_v55, 0.0 }
 0x398   :  { %v451_v41 = vpop.permute.xlu1 %450  ;;  %v481_v23 = vpop.permute.xlu0 %480 }
 0x399   :  { %v3503_v38 = vmul.f32 %v451_v41, %v3341_v31  ;;  %2597 = vpow2.f32 %v505_v3  ;;  %v3514_v11 = vmul.f32 %v3347_v36, %v481_v23  ;;  %v4064_v31 = vlaneseq }
 0x39a   :  { %2599 = vpow2.f32 %v1171_v43  ;;  %v2166_v43 = vadd.f32 -1.0, %v2594_v27 }
 0x39b   :  { %v501_v60 = vmul.f32 1.442695, %v3503_v38  ;;  %v3517_v9 = vand.u32 127, %v4064_v31  ;;  %2601 = vpow2.f32 %v1177_v7  ;;  %v513_v23 = vmul.f32 1.442695, %v3514_v11 }
 0x39c   :  { %v476_v6 = vpop.permute.xlu1 %475  ;;  %v471_v10 = vpop.permute.xlu0 %470  ;;  %vm498_vm4 = vcmp.gt.f32.partialorder %v3514_v11, 0.0 }
 0x39d   :  { %v3520_v41 = vmul.f32 %v471_v10, %v3349_v25  ;;  %v3527_v36 = vmul.f32 %v3343_v21, %v476_v6  ;;  %2603 = vpow2.f32 %v501_v60  ;;  %vm4043_vm1 = vcmp.lt.s32.totalorder %v3517_v9, 16 }
 0x39e   :  { %v2168_v10 = vadd.f32 -1.0, %v2592_v59  ;;  %2605 = vpow2.f32 %v1173_v48 }
 0x39f   :  { %2607 = vpow2.f32 %v513_v23 }
 0x3a0   :  { %v466_v56 = vpop.permute.xlu1 %465 }
 0x3a1   :  { %v3523_v2 = vmul.f32 %v466_v56, %v3345_v0  ;;  %v509_v0 = vmul.f32 1.442695, %v3520_v41 }
 0x3a3   :  { %v507_v7 = vmul.f32 1.442695, %v3523_v2  ;;  %2609 = vpow2.f32 %v509_v0 }
 0x3a4   :  { %v1138_v22 = vpop.permute.xlu1 %1137 }
 0x3a5   :  { %v3544_v6 = vmul.f32 %v1138_v22, %v3401_v16  ;;  %v523_v16 = vsel %vm491_vm13, %v3485_v44, %v2166_v43  ;;  %2611 = vpow2.f32 %v507_v7  ;;  %vm868_vm13 = vcmp.lt.s32.totalorder %v3517_v9, 32 }
 0x3a7   :  { %v1143_v15 = vpop.permute.xlu0 %1142 }
 0x3a8   :  { %v792_v19 = vpop.permute.xlu1 %791  ;;  %v3548_v60 = vmul.f32 %v1143_v15, %v3410_v46  ;;  %v2596_v46 = vpop.eup %2595  ;;  %v1179_v15 = vmul.f32 1.442695, %v3544_v6 }
 0x3a9   :  { %v3537_v31 = vmul.f32 %v3354_v29, %v792_v19  ;;  %v525_v19 = vsel %vm493_vm12, %v485_v63, %v2168_v10  ;;  %v2192_v0 = vadd.f32 -1.0, %v2596_v46  ;;  %vm492_vm12 = vcmp.gt.f32.partialorder %v3503_v38, 0.0 }
 0x3aa   :  { %v1181_v44 = vmul.f32 1.442695, %v3548_v60 }
 0x3ab   :  { %v3505_v49 = vpop.permute.xlu0 %816  ;;  %v839_v22 = vmul.f32 1.442695, %v3537_v31 }
 0x3ac   :  { %v782_v52 = vpop.permute.xlu1 %781 }
 0x3af   :  { %v807_v42 = vpop.permute.xlu0 %806 }
 0x3b0   :  { %v797_v39 = vpop.permute.xlu1 %796  ;;  %v3575_v10 = vmul.f32 %v807_v42, %v3390_v57 }
 0x3b1   :  { %v3531_v3 = vmul.f32 %v3367_v61, %v797_v39  ;;  %v511_v61 = vmul.f32 1.442695, %v3527_v36 }
 0x3b3   :  { %v1469_v25 = vpop.permute.xlu0 %1468  ;;  %v841_v39 = vmul.f32 1.442695, %v3531_v3  ;;  %2613 = vpow2.f32 %v511_v61 }
 0x3b4   :  { %v787_v56 = vpop.permute.xlu1 %786  ;;  %v3558_v48 = vmul.f32 %v3408_v1, %v1469_v25  ;;  %v3571_v1 = vsel %vm4043_vm1, %v523_v16, 0.0 }
 0x3b5   :  { %v3540_v21 = vmul.f32 %v787_v56, %v3374_v58  ;;  %v3552_v58 = vmul.f32 %v782_v52, %v3360_v53  ;;  %v2598_v53 = vpop.eup %2597  ;;  %v3566_v52 = vsel %vm4043_vm1, %v525_v19, 0.0  ;;  %2615 = vpow2.f32 %v841_v39 }
 0x3b6   :  { %v1513_v56 = vmul.f32 1.442695, %v3558_v48  ;;  %v2600_v43 = vpop.eup %2599  ;;  %v2169_v7 = vadd.f32 -1.0, %v2598_v53  ;;  %v3589_v19 = vmul.f32 %v3387_v24, %v3505_v49 }
 0x3b7   :  { %v1459_v29 = vpop.permute.xlu0 %1458  ;;  %v837_v59 = vmul.f32 1.442695, %v3540_v21  ;;  %v835_v25 = vmul.f32 1.442695, %v3552_v58  ;;  %v2602_v39 = vpop.eup %2601  ;;  %v2190_v24 = vadd.f32 -1.0, %v2600_v43 }
 0x3b8   :  { %v812_v27 = vpop.permute.xlu1 %811  ;;  %v3562_v63 = vmul.f32 %v1459_v29, %v3418_v54  ;;  %v2604_v29 = vpop.eup %2603  ;;  %v2193_v49 = vadd.f32 -1.0, %v2602_v39 }
 0x3b9   :  { %2617 = vpow2.f32 %v837_v59  ;;  %v845_v59 = vmul.f32 1.442695, %v3575_v10  ;;  %v2167_v53 = vadd.f32 -1.0, %v2604_v29  ;;  %v3630_v39 = vsel %vm1163_vm15, %v3496_v20, %v2190_v24 }
 0x3ba   :  { %2619 = vpow2.f32 %v839_v22  ;;  %v1509_v61 = vmul.f32 1.442695, %v3562_v63  ;;  %v3595_v22 = vsel %vm1165_vm14, %v3489_v26, %v2192_v0  ;;  %v2606_v26 = vpop.eup %2605  ;;  %vm496_vm14 = vcmp.gt.f32.partialorder %v3520_v41, 0.0 }
 0x3bb   :  { %v1153_v23 = vpop.permute.xlu0 %1152  ;;  %2621 = vpow2.f32 %v1179_v15  ;;  %v526_v15 = vsel %vm494_vm0, %v3492_v55, %v2169_v7  ;;  %v849_v55 = vmul.f32 1.442695, %v3589_v19  ;;  %v524_v20 = vsel %vm492_vm12, %v3503_v38, %v2167_v53 }
 0x3bc   :  { %v802_v54 = vpop.permute.xlu1 %801  ;;  %2623 = vpow2.f32 %v1181_v44  ;;  %v3610_v44 = vmul.f32 %v3379_v30, %v812_v27  ;;  %v3617_v0 = vmul.f32 %v3406_v62, %v1153_v23  ;;  %v3635_v62 = vsel %vm1166_vm2, %v3499_v37, %v2193_v49 }
 0x3bd   :  { %v3584_v57 = vmul.f32 %v802_v54, %v3382_v14  ;;  %2625 = vpow2.f32 %v835_v25  ;;  %v2608_v54 = vpop.eup %2607  ;;  %v3639_v23 = vsel %vm4043_vm1, %v526_v15, 0.0  ;;  %vm4065_vm12 = vcmp.gt.f32.partialorder %v3510_v17, 0.0 }
 0x3be   :  { %2627 = vpow2.f32 %v1513_v56  ;;  %v2610_v43 = vpop.eup %2609  ;;  %v847_v29 = vmul.f32 1.442695, %v3610_v44  ;;  %vm827_vm2 = vcmp.gt.f32.partialorder %v3552_v58, 0.0  ;;  %vm828_vm0 = vcmp.gt.f32.partialorder %v3540_v21, 0.0 }
 0x3bf   :  { %v1479_v42 = vpop.permute.xlu0 %1478  ;;  %2629 = vpow2.f32 %v1509_v61  ;;  %v2612_v61 = vpop.eup %2611  ;;  %vm4076_vm15 = vcmp.gt.f32.partialorder %v3544_v6, 0.0 }
 0x3c0   :  { %v1464_v16 = vpop.permute.xlu1 %1463  ;;  %v3599_v14 = vmul.f32 %v1479_v42, %v3441_v4  ;;  %v843_v4 = vmul.f32 1.442695, %v3584_v57  ;;  %2631 = vpow2.f32 %v845_v59  ;;  %v2173_v42 = vadd.f32 -1.0, %v2608_v54 }
 0x3c1   :  { %v3602_v46 = vmul.f32 %v3394_v18, %v1464_v16  ;;  %v2171_v59 = vadd.f32 -1.0, %v2610_v43  ;;  %v1185_v16 = vmul.f32 1.442695, %v3617_v0 }
 0x3c2   :  { %v1517_v30 = vmul.f32 1.442695, %v3599_v14 }
 0x3c3   :  { %v1511_v18 = vmul.f32 1.442695, %v3602_v46  ;;  %v1489_v25 = vpop.permute.xlu0 %1488  ;;  %v528_v43 = vsel %vm496_vm14, %v3520_v41, %v2171_v59  ;;  %vm4067_vm14 = vcmp.gt.f32.partialorder %v3527_v36, 0.0 }
 0x3c4   :  { %v1454_v56 = vpop.permute.xlu1 %1453  ;;  %v3622_v27 = vmul.f32 %v3435_v5, %v1489_v25  ;;  %v2191_v5 = vadd.f32 -1.0, %v2606_v26  ;;  %v2170_v26 = vadd.f32 -1.0, %v2612_v61 }
 0x3c5   :  { %2633 = vpow2.f32 %v1511_v18  ;;  %v3625_v7 = vmul.f32 %v1454_v56, %v3399_v35  ;;  %v2614_v35 = vpop.eup %2613 }
 0x3c6   :  { %2635 = vpow2.f32 %v843_v4  ;;  %v2616_v37 = vpop.eup %2615  ;;  %v1521_v38 = vmul.f32 1.442695, %v3622_v27  ;;  %v3658_v18 = vsel %vm4065_vm12, %v3510_v17, %v2191_v5  ;;  %v2172_v25 = vadd.f32 -1.0, %v2614_v35 }
 0x3c7   :  { %2637 = vpow2.f32 %v849_v55  ;;  %v1507_v24 = vmul.f32 1.442695, %v3625_v7  ;;  %v2618_v15 = vpop.eup %2617  ;;  %v3663_v55 = vsel %vm4043_vm1, %v524_v20, 0.0  ;;  %vm830_vm12 = vcmp.gt.f32.partialorder %v3531_v3, 0.0 }
 0x3c8   :  { %v1148_v49 = vpop.permute.xlu1 %1147  ;;  %2639 = vpow2.f32 %v1517_v30  ;;  %v2620_v4 = vpop.eup %2619  ;;  %v2181_v30 = vadd.f32 -1.0, %v2616_v37  ;;  %v2179_v61 = vadd.f32 -1.0, %v2618_v15  ;;  %v3688_v37 = vsel %vm4067_vm14, %v3527_v36, %v2172_v25 }
 0x3c9   :  { %v3653_v53 = vmul.f32 %v3397_v47, %v1148_v49  ;;  %2641 = vpow2.f32 %v1507_v24  ;;  %v2622_v54 = vpop.eup %2621  ;;  %v530_v47 = vsel %vm498_vm4, %v3514_v11, %v2173_v42  ;;  %vm4066_vm4 = vcmp.gt.f32.partialorder %v3523_v2, 0.0 }
 0x3ca   :  { %2643 = vpow2.f32 %v847_v29  ;;  %v2624_v56 = vpop.eup %2623  ;;  %v527_v11 = vsel %vm4066_vm4, %v3523_v2, %v2170_v26  ;;  %v2180_v20 = vadd.f32 -1.0, %v2620_v4  ;;  %v3683_v41 = vsel %vm4043_vm1, %v530_v47, 0.0 }
 0x3cb   :  { %v1183_v17 = vmul.f32 1.442695, %v3653_v53  ;;  %2645 = vpow2.f32 %v1185_v16  ;;  %v2626_v35 = vpop.eup %2625  ;;  %v3702_v36 = vsel %vm4043_vm1, %v527_v11, 0.0  ;;  %v862_v24 = vsel %vm830_vm12, %v3531_v3, %v2181_v30 }
 0x3cc   :  { %v1474_v5 = vpop.permute.xlu1 %1473  ;;  %2647 = vpow2.f32 %v1521_v38  ;;  %v2628_v29 = vpop.eup %2627  ;;  %v2178_v16 = vadd.f32 -1.0, %v2626_v35  ;;  %v860_v49 = vsel %vm828_vm0, %v3540_v21, %v2179_v61  ;;  %v2194_v38 = vadd.f32 -1.0, %v2622_v54 }
 0x3cd   :  { %v3679_v42 = vmul.f32 %v1474_v5, %v3429_v50  ;;  %2649 = vpow2.f32 %v1183_v17  ;;  %v2630_v2 = vpop.eup %2629  ;;  %v3694_v50 = vsel %vm4043_vm1, %v528_v43, 0.0  ;;  %vm4068_vm14 = vcmp.ge.s32.totalorder %v3517_v9, 16 }
 0x3ce   :  { %v2632_v26 = vpop.eup %2631  ;;  %vm3710_vm4 = vmand %vm4068_vm14, %vm868_vm13  ;;  %vm4071_vm1 = vcmp.gt.f32.partialorder %v3537_v31, 0.0  ;;  %v2195_v54 = vadd.f32 -1.0, %v2624_v56  ;;  %v2205_v47 = vadd.f32 -1.0, %v2628_v29  ;;  %v2203_v17 = vadd.f32 -1.0, %v2630_v2 }
 0x3cf   :  { %v1515_v59 = vmul.f32 1.442695, %v3679_v42  ;;  %v861_v25 = vsel %vm4071_vm1, %v3537_v31, %v2180_v20  ;;  %v873_v43 = vsel %vm3710_vm4, %v862_v24, %v3639_v23  ;;  %v871_v31 = vsel %vm3710_vm4, %v860_v49, %v3663_v55 }
 0x3d0   :  { %v1484_v15 = vpop.permute.xlu1 %1483  ;;  %v859_v56 = vsel %vm827_vm2, %v3552_v58, %v2178_v16  ;;  %v2183_v35 = vadd.f32 -1.0, %v2632_v26  ;;  %vm4072_vm1 = vcmp.lt.s32.totalorder %v3517_v9, 48  ;;  %vm4073_vm13 = vcmp.ge.s32.totalorder %v3517_v9, 32 }
 0x3d1   :  { %2651 = vpow2.f32 %v1515_v59  ;;  %v3719_v3 = vmul.f32 %v3423_v40, %v1484_v15  ;;  %v872_v40 = vsel %vm3710_vm4, %v861_v25, %v3566_v52  ;;  %vm3739_vm12 = vmand %vm4073_vm13, %vm4072_vm1  ;;  %vm1501_vm14 = vcmp.gt.f32.partialorder %v3602_v46, 0.0 }
 0x3d2   :  { %v2634_v21 = vpop.eup %2633  ;;  %v3747_v52 = vsel %vm4076_vm15, %v3544_v6, %v2194_v38  ;;  %vm1500_vm0 = vcmp.gt.f32.partialorder %v3562_v63, 0.0  ;;  %v1209_v20 = vsel %vm3739_vm12, %v3635_v62, %v873_v43  ;;  %vm4077_vm1 = vcmp.lt.s32.totalorder %v3517_v9, 64 }
 0x3d3   :  { %v2204_v30 = vadd.f32 -1.0, %v2634_v21  ;;  %v1519_v61 = vmul.f32 1.442695, %v3719_v3  ;;  %v2636_v5 = vpop.eup %2635  ;;  %vm4078_vm13 = vcmp.ge.s32.totalorder %v3517_v9, 48  ;;  %vm4081_vm15 = vcmp.gt.f32.partialorder %v3558_v48, 0.0 }
 0x3d4   :  { %v2638_v55 = vpop.eup %2637  ;;  %vm3759_vm9 = vmand %vm4078_vm13, %vm4077_vm1  ;;  %v1534_v6 = vsel %vm4081_vm15, %v3558_v48, %v2205_v47  ;;  %v1532_v2 = vsel %vm1500_vm0, %v3562_v63, %v2203_v17  ;;  %vm4082_vm2 = vcmp.gt.f32.partialorder %v3548_v60, 0.0  ;;  %v870_v16 = vsel %vm3710_vm4, %v859_v56, %v3571_v1 }
 0x3d5   :  { %v1533_v58 = vsel %vm1501_vm14, %v3602_v46, %v2204_v30  ;;  %2653 = vpow2.f32 %v1519_v61  ;;  %v2640_v11 = vpop.eup %2639  ;;  %v1207_v46 = vsel %vm3739_vm12, %v3658_v18, %v871_v31  ;;  %v1200_v59 = vsel %vm4082_vm2, %v3548_v60, %v2195_v54 }
 0x3d6   :  { %v2642_v62 = vpop.eup %2641  ;;  %v2182_v24 = vadd.f32 -1.0, %v2636_v5  ;;  %v1208_v48 = vsel %vm3739_vm12, %v3595_v22, %v872_v40  ;;  %v2185_v15 = vadd.f32 -1.0, %v2638_v55  ;;  %vm4083_vm0 = vcmp.gt.f32.partialorder %v3575_v10, 0.0 }
 0x3d7   :  { %v2644_v49 = vpop.eup %2643  ;;  %v864_v63 = vsel %vm4083_vm0, %v3575_v10, %v2183_v35  ;;  %v1544_v60 = vsel %vm3759_vm9, %v1533_v58, %v1208_v48  ;;  %v2202_v18 = vadd.f32 -1.0, %v2642_v62  ;;  %v1545_v1 = vsel %vm3759_vm9, %v1534_v6, %v1209_v20 }
 0x3d8   :  { %v2646_v26 = vpop.eup %2645  ;;  %v1543_v38 = vsel %vm3759_vm9, %v1532_v2, %v1207_v46  ;;  %v2207_v22 = vadd.f32 -1.0, %v2640_v11  ;;  %vm1499_vm2 = vcmp.gt.f32.partialorder %v3625_v7, 0.0  ;;  %vm831_vm13 = vcmp.gt.f32.partialorder %v3584_v57, 0.0 }
 0x3d9   :  { %v2648_v25 = vpop.eup %2647  ;;  %vm1504_vm15 = vcmp.gt.f32.partialorder %v3599_v14, 0.0  ;;  %v1206_v10 = vsel %vm3739_vm12, %v3630_v39, %v870_v16  ;;  %v1531_v21 = vsel %vm1499_vm2, %v3625_v7, %v2202_v18  ;;  %v875_v47 = vsel %vm3710_vm4, %v864_v63, %v3694_v50 }
 0x3da   :  { %v2650_v54 = vpop.eup %2649  ;;  %v863_v17 = vsel %vm831_vm13, %v3584_v57, %v2182_v24  ;;  %vm4084_vm0 = vcmp.eq.s32.totalorder %v3517_v9, 64  ;;  %v1542_v31 = vsel %vm3759_vm9, %v1531_v21, %v1206_v10  ;;  %v2197_v7 = vadd.f32 -1.0, %v2646_v26 }
 0x3db   :  { %v1553_v43 = vsel %vm4084_vm0, 1.0, %v1544_v60  ;;  %vm4085_vm1 = vmmov %vm4084_vm0  ;;  %v2184_v5 = vadd.f32 -1.0, %v2644_v49  ;;  %v1536_v50 = vsel %vm1504_vm15, %v3599_v14, %v2207_v22  ;;  %v2209_v57 = vadd.f32 -1.0, %v2648_v25 }
 0x3dc   :  { %v1554_v30 = vsel %vm4085_vm1, 1.0, %v1545_v1  ;;  %vm4086_vm14 = vmmov %vm4084_vm0  ;;  %vm1170_vm13 = vcmp.gt.f32.partialorder %v3617_v0, 0.0  ;;  %v874_v35 = vsel %vm3710_vm4, %v863_v17, %v3702_v36  ;;  %v2196_v58 = vadd.f32 -1.0, %v2650_v54  ;;  %v1658_v1 = vld [vmem:[%s4035_s5] sm:$0x1] }
 0x3dd   :  { %v1552_v39 = vsel %vm4086_vm14, 1.0, %v1543_v38  ;;  %vm4087_vm2 = vmmov %vm4084_vm0  ;;  %v1560_v55 = vpack.c.bf16 %v1554_v30, %v1553_v43  ;;  %vm4088_vm14 = vcmp.gt.f32.partialorder %v3589_v19, 0.0  ;;  %v1211_v20 = vsel %vm3739_vm12, %v1200_v59, %v875_v47 }
 0x3de   :  { %v1551_v61 = vsel %vm4087_vm2, 1.0, %v1542_v31  ;;  %v2652_v56 = vpop.eup %2651  ;;  %v866_v11 = vsel %vm4088_vm14, %v3589_v19, %v2185_v15  ;;  %vm1506_vm1 = vcmp.gt.f32.partialorder %v3622_v27, 0.0  ;;  %vm4089_vm15 = vcmask 531456  }
 0x3df   :  { %v1559_v40 = vpack.c.bf16 %v1552_v39, %v1551_v61  ;;  %v2206_v14 = vadd.f32 -1.0, %v2652_v56  ;;  %v1202_v6 = vsel %vm1170_vm13, %v3617_v0, %v2197_v7  ;;  %v1547_v46 = vsel %vm3759_vm9, %v1536_v50, %v1211_v20  ;;  %vm4090_vm11 = vmmov %vm4089_vm15 }
 0x3e0   :  { %vm1169_vm0 = vcmp.gt.f32.partialorder %v3653_v53, 0.0  ;;  %vm1503_vm2 = vcmp.gt.f32.partialorder %v3679_v42, 0.0  ;;  %vm4091_vm14 = vcmp.gt.f32.partialorder %v3610_v44, 0.0  ;;  %v1538_v36 = vsel %vm1506_vm1, %v3622_v27, %v2209_v57 }
 0x3e1   :  { %2393 = vmatprep.mubr.msk.bf16.mxu1 %vm4089_vm15, %v1559_v40  ;;  %v865_v19 = vsel %vm4091_vm14, %v3610_v44, %v2184_v5  ;;  %v1210_v2 = vsel %vm3739_vm12, %v3747_v52, %v874_v35  ;;  %v1535_v0 = vsel %vm1503_vm2, %v3679_v42, %v2206_v14  ;;  %vm4092_vm13 = vcmp.lt.s32.totalorder %v3517_v9, 16 }
 0x3e2   :  { %2394 = vmatmul.mubr.msk.bf16.vlgmr.msra.gmra.mxu1 %vm4090_vm11, %v1560_v55  ;;  %v2654_v62 = vpop.eup %2653  ;;  %v540_v59 = vsel %vm4092_vm13, %v3688_v37, 0.0  ;;  %v877_v16 = vsel %vm3710_vm4, %v866_v11, %v3683_v41  ;;  %v1201_v24 = vsel %vm1169_vm0, %v3653_v53, %v2196_v58  ;;  %v1546_v44 = vsel %vm3759_vm9, %v1535_v0, %v1210_v2 }
 0x3e3   :  { %v1213_v27 = vsel %vm3739_vm12, %v1202_v6, %v877_v16  ;;  %vm4093_vm11 = vcmp.eq.s32.totalorder %v3517_v9, 64  ;;  %v2208_v48 = vadd.f32 -1.0, %v2654_v62  ;;  %v876_v37 = vsel %vm3710_vm4, %v865_v19, %v540_v59 }
 0x3e4   :  { %v1556_v42 = vsel %vm4093_vm11, 1.0, %v1547_v46  ;;  %vm4094_vm1 = vmmov %vm4093_vm11  ;;  %v1549_v41 = vsel %vm3759_vm9, %v1538_v36, %v1213_v27  ;;  %vm1505_vm15 = vcmp.gt.f32.partialorder %v3719_v3, 0.0  ;;  %v1212_v49 = vsel %vm3739_vm12, %v1201_v24, %v876_v37 }
 0x3e5   :  { %v1555_v52 = vsel %vm4094_vm1, 1.0, %v1546_v44  ;;  %v1537_v15 = vsel %vm1505_vm15, %v3719_v3, %v2208_v48  ;;  %vm4095_vm0 = vcmask 531456   ;;  %vm4096_vm2 = vmmov %vm4094_vm1  ;;  %v1659_v38 = vpack.c.bf16 %v1658_v1, %v1658_v1 }
 0x3e6   :  { %v1561_v53 = vpack.c.bf16 %v1556_v42, %v1555_v52  ;;  %v1548_v63 = vsel %vm3759_vm9, %v1537_v15, %v1212_v49  ;;  %v1558_v4 = vsel %vm4096_vm2, 1.0, %v1549_v41  ;;  %vm4097_vm4 = vmmov %vm4094_vm1  ;;  %v2743_v22 = vmov 126  }
 0x3e7   :  { %v1557_v60 = vsel %vm4097_vm4, 1.0, %v1548_v63  ;;  %vm4098_vm14 = vmmov %vm4095_vm0  ;;  %2459 = vset.pattern.permute.xlu1 %v2743_v22  ;;  %2460 = vset.pattern.permute.xlu0 %v2743_v22  ;;  %vm4105_vm15 = vcmask 523264  }
 0x3e8   :  { %2397 = vmatprep.mubr.msk.bf16.mxu1 %vm4095_vm0, %v1561_v53  ;;  %v1562_v18 = vpack.c.bf16 %v1558_v4, %v1557_v60  ;;  %vm4099_vm13 = vmmov %vm4095_vm0 }
 0x3e9   :  { %vm4100_vm12 = vmmov %vm4095_vm0 }
 0x3ea   :  { %2398 = vmatmul.mubr.msk.bf16.gmra.mxu1 %vm4098_vm14, %v1562_v18  ;;  %v1588_v26 = vsel %vm4099_vm13, %v1562_v18, 0  ;;  %v1585_v3 = vsel %vm4100_vm12, %v1561_v53, 0  ;;  %vm4101_vm9 = vmmov %vm4095_vm0 }
 0x3eb   :  { %2402 = vmatpush3.bf16.xpose.msra.mxu0 %v1588_v26  ;;  %v1582_v23 = vsel %vm4101_vm9, %v1560_v55, 0  ;;  %vm4102_vm11 = vmmov %vm4095_vm0 }
 0x3ec   :  { %2403 = vmatprep.subr.bf16.mxu0 %v4063_v51  ;;  %v1579_v29 = vsel %vm4102_vm11, %v1559_v40, 0  ;;  %vm4103_vm1 = vmmov %vm4095_vm0  ;;  %v4104_v40 = vsub.s32 0, %v2883_v45 }
 0x3ed   :  { %vm4106_vm0 = vmmov %vm4105_vm15 }
 0x3ee   :  { %vm4107_vm2 = vmmov %vm4106_vm0 }
 0x3ef   :  { %vm4112_vm4 = vmmov %vm4106_vm0 }
 0x3f0   :  { %vm4115_vm14 = vmmov %vm4106_vm0 }
 0x3f3   :  { %2404 = vmatpush3.bf16.xpose.msra.mxu0 %v1585_v3 }
 0x3f4   :  { %2405 = vmatprep.subr.bf16.mxu0 %v4063_v51 }
 0x3fb   :  { %2406 = vmatpush3.bf16.xpose.msra.mxu0 %v1582_v23 }
 0x3fc   :  { %2407 = vmatprep.subr.bf16.mxu0 %v4063_v51 }
 0x403   :  { %2408 = vmatpush3.bf16.xpose.msra.mxu0 %v1579_v29 }
 0x40a   :  { %2410 = vmatmul.mubr.msk.bf16.vlgmr.msra.gmra.mxu0 %vm4103_vm1, %v1659_v38 }
 0x4a2   :  { %v2395_v25 = vpop.f32.mrf.mxu1 }
 0x4a4   :  { %v1627_v10 = vpop.f32.mrf.mxu1 }
 0x4a5   :  { %1709 = vperm.xlu1 %2459, %v1627_v10  }
 0x4a6   :  { %v2396_v21 = vpop.f32.mrf.mxu1 }
 0x4a7   :  { %v1704_v39 = vpack.c.bf16 %v2396_v21, %v2395_v25 }
 0x4a8   :  { %v1630_v54 = vpop.f32.mrf.mxu1 }
 0x4a9   :  { %1719 = vperm.xlu1 %2459, %v2395_v25   ;;  %1714 = vperm.xlu0 %2460, %v1630_v54   ;;  %v1703_v7 = vpack.c.bf16 %v1630_v54, %v1627_v10  ;;  %v4113_v54 = vld [vmem:[#allocation2_spill] sm:$0xff] }
 0x4aa   :  { %v2399_v51 = vpop.f32.mrf.mxu1 }
 0x4ac   :  { %v1643_v47 = vpop.f32.mrf.mxu1 }
 0x4ad   :  { %1724 = vperm.xlu1 %2459, %v2396_v21   ;;  %1729 = vperm.xlu0 %2460, %v1643_v47  }
 0x4ae   :  { %v2400_v17 = vpop.f32.mrf.mxu1 }
 0x4af   :  { %v1706_v43 = vpack.c.bf16 %v2400_v17, %v2399_v51 }
 0x4b0   :  { %v1646_v31 = vpop.f32.mrf.mxu1 }
 0x4b1   :  { %v1705_v30 = vpack.c.bf16 %v1646_v31, %v1643_v47  ;;  %1739 = vperm.xlu0 %2460, %v2399_v51   ;;  %2413 = vmatprep.subr.bf16.mxu1 %v1706_v43 }
 0x4b2   :  { %1734 = vperm.xlu1 %2459, %v1646_v31   ;;  %2414 = vmatpush3.bf16.msra.mxu1 %v1706_v43 }
 0x4b3   :  { %2415 = vmatprep.subr.bf16.mxu1 %v1705_v30 }
 0x4b6   :  { %1744 = vperm.xlu1 %2459, %v2400_v17   ;;  %2416 = vmatpush3.bf16.msra.mxu1 %v1705_v30 }
 0x4b7   :  { %2417 = vmatprep.subr.bf16.mxu1 %v1704_v39 }
 0x4ba   :  { %2418 = vmatpush3.bf16.msra.mxu1 %v1704_v39 }
 0x4bb   :  { %2419 = vmatprep.subr.bf16.mxu1 %v1703_v7 }
 0x4be   :  { %2420 = vmatpush3.bf16.msra.mxu1 %v1703_v7 }
 0x4ca   :  { %v1697_v61 = vpop.f32.mrf.mxu0 }
 0x4cb   :  { %v1750_v56 = vrot.slane %v1697_v61, %v4104_v40 }
 0x4cc   :  { %v2411_v5 = vpop.f32.mrf.mxu0 }
 0x4ce   :  { %v1700_v50 = vpop.f32.mrf.mxu0 }
 0x4d0   :  { %v2412_v57 = vpop.f32.mrf.mxu0 }
 0x520   :  { %v1710_v35 = vpop.permute.xlu1 %1709 }
 0x521   :  { %v1751_v55 = vadd.f32 %v1750_v56, %v1710_v35 }
 0x523   :  { %v1759_v58 = vmul.f32 0.2, %v1751_v55 }
 0x524   :  { %v1720_v11 = vpop.permute.xlu1 %1719  ;;  %v1715_v20 = vpop.permute.xlu0 %1714 }
 0x525   :  { %v1767_v14 = vmax.f32 %v1751_v55, %v1759_v58  ;;  %v1753_v6 = vadd.f32 %v1750_v56, %v1720_v11  ;;  %v1752_v46 = vadd.f32 %v1750_v56, %v1715_v20 }
 0x527   :  { %v1761_v19 = vmul.f32 0.2, %v1753_v6  ;;  %v1760_v36 = vmul.f32 0.2, %v1752_v46  ;;  %v1775_v2 = vsel %vm2977_vm5, %v1767_v14, inf  ;;  %vm4109_vm5 = vmmov %vm4106_vm0 }
 0x528   :  { %v1725_v0 = vpop.permute.xlu1 %1724  ;;  %v1783_v62 = vsel %vm4105_vm15, %v1775_v2, inf  ;;  %v1730_v24 = vpop.permute.xlu0 %1729 }
 0x529   :  { %v1769_v59 = vmax.f32 %v1753_v6, %v1761_v19  ;;  %v1768_v16 = vmax.f32 %v1752_v46, %v1760_v36  ;;  %v1754_v45 = vadd.f32 %v1750_v56, %v1725_v0  ;;  %1784 = vmin.xlane.f32.xlu0 %v1783_v62  ;;  %v1755_v27 = vadd.f32 %v1750_v56, %v1730_v24 }
 0x52b   :  { %v1762_v44 = vmul.f32 0.2, %v1754_v45  ;;  %v1777_v42 = vsel %vm2972_vm3, %v1769_v59, inf  ;;  %v1776_v52 = vsel %vm3036_vm7, %v1768_v16, inf  ;;  %v1763_v41 = vmul.f32 0.2, %v1755_v27  ;;  %vm4108_vm3 = vmmov %vm4106_vm0 }
 0x52c   :  { %v1789_v48 = vsel %vm4106_vm0, %v1777_v42, inf  ;;  %v1786_v13 = vsel %vm4107_vm2, %v1776_v52, inf  ;;  %v1740_v53 = vpop.permute.xlu0 %1739  ;;  %vm4111_vm7 = vmmov %vm4106_vm0 }
 0x52d   :  { %v1770_v37 = vmax.f32 %v1754_v45, %v1762_v44  ;;  %1790 = vmin.xlane.f32.xlu0 %v1789_v48  ;;  %1787 = vmin.xlane.f32.xlu1 %v1786_v13  ;;  %v1771_v49 = vmax.f32 %v1755_v27, %v1763_v41  ;;  %v1735_v15 = vpop.permute.xlu1 %1734  ;;  %v1757_v63 = vadd.f32 %v1750_v56, %v1740_v53 }
 0x52e   :  { %v1756_v8 = vadd.f32 %v1750_v56, %v1735_v15 }
 0x52f   :  { %v1778_v4 = vsel %vm3007_vm6, %v1770_v37, inf  ;;  %v1765_v12 = vmul.f32 0.2, %v1757_v63  ;;  %v1779_v18 = vsel %vm3098_vm10, %v1771_v49, inf  ;;  %vm4110_vm6 = vnez %v4062_v34 }
 0x530   :  { %v1792_v60 = vsel %vm4108_vm3, %v1778_v4, inf  ;;  %v1764_v26 = vmul.f32 0.2, %v1756_v8  ;;  %v1795_v3 = vsel %vm4109_vm5, %v1779_v18, inf  ;;  %vm4114_vm10 = vnez %v4113_v54  ;;  %vm4116_vm3 = vmmov %vm4107_vm2 }
 0x531   :  { %1793 = vmin.xlane.f32.xlu0 %v1792_v60  ;;  %v1773_v23 = vmax.f32 %v1757_v63, %v1765_v12  ;;  %v1745_v29 = vpop.permute.xlu1 %1744  ;;  %1796 = vmin.xlane.f32.xlu1 %v1795_v3  ;;  %vm4117_vm5 = vmmov %vm4107_vm2 }
 0x532   :  { %v1772_v1 = vmax.f32 %v1756_v8, %v1764_v26  ;;  %v1758_v38 = vadd.f32 %v1750_v56, %v1745_v29  ;;  %v2744_v8 = vmov 127  }
 0x533   :  { %v1781_v33 = vsel %vm3051_vm8, %v1773_v23, inf  ;;  %2461 = vset.pattern.permute.xlu1 %v2744_v8  ;;  %2462 = vset.pattern.permute.xlu0 %v2744_v8 }
 0x534   :  { %v1766_v22 = vmul.f32 0.2, %v1758_v38  ;;  %v1780_v25 = vsel %vm4110_vm6, %v1772_v1, inf  ;;  %v1801_v10 = vsel %vm4111_vm7, %v1781_v33, inf  ;;  %vm4118_vm6 = vmmov %vm4107_vm2 }
 0x535   :  { %v1798_v32 = vsel %vm4112_vm4, %v1780_v25, inf  ;;  %1802 = vmin.xlane.f32.xlu1 %v1801_v10 }
 0x536   :  { %v1774_v21 = vmax.f32 %v1758_v38, %v1766_v22  ;;  %1799 = vmin.xlane.f32.xlu0 %v1798_v32 }
 0x538   :  { %v1782_v51 = vsel %vm4114_vm10, %v1774_v21, inf }
 0x539   :  { %v1804_v47 = vsel %vm4115_vm14, %v1782_v51, inf }
 0x53a   :  { %1805 = vmin.xlane.f32.xlu0 %v1804_v47 }
 0x5b2   :  { %v1785_v17 = vpop.xlane.xlu0 %1784 }
 0x5b3   :  { %vm1807_vm13 = vcmp.eq.f32.partialorder %v1785_v17, inf }
 0x5b4   :  { %v1815_v28 = vsel %vm1807_vm13, 0.0, %v1785_v17 }
 0x5b5   :  { %v1823_v43 = vsub.f32 %v1815_v28, %v1775_v2 }
 0x5b6   :  { %v1788_v31 = vpop.xlane.xlu1 %1787  ;;  %v1791_v34 = vpop.xlane.xlu0 %1790 }
 0x5b7   :  { %vm1808_vm8 = vcmp.eq.f32.partialorder %v1788_v31, inf  ;;  %vm1809_vm12 = vcmp.eq.f32.partialorder %v1791_v34, inf  ;;  %v1831_v30 = vmul.f32 1.442695, %v1823_v43 }
 0x5b8   :  { %v1816_v39 = vsel %vm1808_vm8, 0.0, %v1788_v31  ;;  %v1817_v7 = vsel %vm1809_vm12, 0.0, %v1791_v34 }
 0x5b9   :  { %v1824_v61 = vsub.f32 %v1816_v39, %v1776_v52  ;;  %v1825_v5 = vsub.f32 %v1817_v7, %v1777_v42  ;;  %2655 = vpow2.f32 %v1831_v30 }
 0x5ba   :  { %v1794_v50 = vpop.xlane.xlu0 %1793  ;;  %v1797_v35 = vpop.xlane.xlu1 %1796 }
 0x5bb   :  { %v1833_v57 = vmul.f32 1.442695, %v1824_v61  ;;  %vm1810_vm9 = vcmp.eq.f32.partialorder %v1794_v50, inf  ;;  %v1835_v40 = vmul.f32 1.442695, %v1825_v5  ;;  %vm1811_vm11 = vcmp.eq.f32.partialorder %v1797_v35, inf }
 0x5bc   :  { %v1818_v56 = vsel %vm1810_vm9, 0.0, %v1794_v50  ;;  %v1819_v58 = vsel %vm1811_vm11, 0.0, %v1797_v35  ;;  %vm2040_vm11 = vcmp.lt.s32.totalorder %v3517_v9, 8 }
 0x5bd   :  { %2657 = vpow2.f32 %v1833_v57  ;;  %v1826_v55 = vsub.f32 %v1818_v56, %v1778_v4  ;;  %v1827_v20 = vsub.f32 %v1819_v58, %v1779_v18 }
 0x5be   :  { %2659 = vpow2.f32 %v1835_v40  ;;  %v1803_v14 = vpop.xlane.xlu1 %1802 }
 0x5bf   :  { %v1837_v11 = vmul.f32 1.442695, %v1826_v55  ;;  %vm1813_vm1 = vcmp.eq.f32.partialorder %v1803_v14, inf  ;;  %v1800_v6 = vpop.xlane.xlu0 %1799  ;;  %v1839_v19 = vmul.f32 1.442695, %v1827_v20 }
 0x5c0   :  { %v1821_v46 = vsel %vm1813_vm1, 0.0, %v1803_v14  ;;  %vm1812_vm15 = vcmp.eq.f32.partialorder %v1800_v6, inf }
 0x5c1   :  { %2661 = vpow2.f32 %v1837_v11  ;;  %v1829_v36 = vsub.f32 %v1821_v46, %v1781_v33  ;;  %v1820_v2 = vsel %vm1812_vm15, 0.0, %v1800_v6 }
 0x5c2   :  { %v1828_v0 = vsub.f32 %v1820_v2, %v1780_v25  ;;  %2663 = vpow2.f32 %v1839_v19 }
 0x5c3   :  { %v1806_v62 = vpop.xlane.xlu0 %1805  ;;  %v1843_v16 = vmul.f32 1.442695, %v1829_v36 }
 0x5c4   :  { %v1841_v59 = vmul.f32 1.442695, %v1828_v0  ;;  %vm1814_vm0 = vcmp.eq.f32.partialorder %v1806_v62, inf }
 0x5c5   :  { %v1822_v45 = vsel %vm1814_vm0, 0.0, %v1806_v62 }
 0x5c6   :  { %2665 = vpow2.f32 %v1841_v59  ;;  %v1830_v24 = vsub.f32 %v1822_v45, %v1782_v51  ;;  %v2656_v44 = vpop.eup %2655 }
 0x5c7   :  { %2667 = vpow2.f32 %v1843_v16 }
 0x5c8   :  { %v1845_v42 = vmul.f32 1.442695, %v1830_v24 }
 0x5ca   :  { %v2658_v27 = vpop.eup %2657  ;;  %2669 = vpow2.f32 %v1845_v42 }
 0x5cb   :  { %v1847_v52 = vpack.c.bf16 %v2658_v27, %v2656_v44  ;;  %v2660_v48 = vpop.eup %2659 }
 0x5cd   :  { %2421 = vmatprep.mubr.msk.bf16.mxu1 %vm4107_vm2, %v1847_v52 }
 0x5ce   :  { %v2662_v13 = vpop.eup %2661 }
 0x5cf   :  { %v1848_v37 = vpack.c.bf16 %v2662_v13, %v2660_v48  ;;  %v2664_v41 = vpop.eup %2663 }
 0x5d1   :  { %2422 = vmatmul.mubr.msk.bf16.vlgmr.msra.gmra.mxu1 %vm4116_vm3, %v1848_v37 }
 0x5d3   :  { %v2666_v53 = vpop.eup %2665 }
 0x5d4   :  { %v1849_v49 = vpack.c.bf16 %v2666_v53, %v2664_v41  ;;  %v2668_v15 = vpop.eup %2667 }
 0x5d6   :  { %2425 = vmatprep.mubr.msk.bf16.mxu1 %vm4117_vm5, %v1849_v49 }
 0x5d7   :  { %v2670_v63 = vpop.eup %2669 }
 0x5d8   :  { %v1850_v4 = vpack.c.bf16 %v2670_v63, %v2668_v15 }
 0x5da   :  { %2426 = vmatmul.mubr.msk.bf16.gmra.mxu1 %vm4118_vm6, %v1850_v4 }
 0x691   :  { %v2423_v60 = vpop.f32.mrf.mxu1 }
 0x692   :  { %vm1930_vm4 = vcmp.gt.f32.partialorder %v2423_v60, 0.0 }
 0x693   :  { %v1897_v12 = vpop.f32.mrf.mxu1  ;;  %v1938_v23 = vsel %vm1930_vm4, %v2423_v60, 1.0 }
 0x694   :  { %vm1928_vm7 = vcmp.gt.f32.partialorder %v1897_v12, 0.0 }
 0x695   :  { %v2424_v18 = vpop.f32.mrf.mxu1  ;;  %v1936_v26 = vsel %vm1928_vm7, %v1897_v12, 1.0 }
 0x696   :  { %1946 = vperm.xlu1 %2461, %v1936_v26   ;;  %vm1931_vm14 = vcmp.gt.f32.partialorder %v2424_v18, 0.0 }
 0x697   :  { %v1900_v3 = vpop.f32.mrf.mxu1  ;;  %v1939_v38 = vsel %vm1931_vm14, %v2424_v18, 1.0 }
 0x698   :  { %vm1929_vm10 = vcmp.gt.f32.partialorder %v1900_v3, 0.0 }
 0x699   :  { %v1937_v29 = vsel %vm1929_vm10, %v1900_v3, 1.0 }
 0x69a   :  { %1956 = vperm.xlu1 %2461, %v1938_v23   ;;  %1951 = vperm.xlu0 %2462, %v1937_v29   ;;  %v2427_v1 = vpop.f32.mrf.mxu1 }
 0x69b   :  { %vm1934_vm13 = vcmp.gt.f32.partialorder %v2427_v1, 0.0 }
 0x69c   :  { %v1913_v33 = vpop.f32.mrf.mxu1  ;;  %v1942_v25 = vsel %vm1934_vm13, %v2427_v1, 1.0 }
 0x69d   :  { %vm1932_vm8 = vcmp.gt.f32.partialorder %v1913_v33, 0.0 }
 0x69e   :  { %1961 = vperm.xlu1 %2461, %v1939_v38   ;;  %v3908_v22 = vpop.f32.mrf.mxu1  ;;  %v1940_v32 = vsel %vm1932_vm8, %v1913_v33, 1.0 }
 0x69f   :  { %vm1935_vm9 = vcmp.gt.f32.partialorder %v3908_v22, 0.0 }
 0x6a0   :  { %v1916_v10 = vpop.f32.mrf.mxu1  ;;  %v1943_v54 = vsel %vm1935_vm9, %v3908_v22, 1.0 }
 0x6a1   :  { %vm1933_vm12 = vcmp.gt.f32.partialorder %v1916_v10, 0.0 }
 0x6a2   :  { %1976 = vperm.xlu1 %2461, %v1942_v25   ;;  %v1941_v21 = vsel %vm1933_vm12, %v1916_v10, 1.0 }
 0x6a6   :  { %1966 = vperm.xlu1 %2461, %v1940_v32  }
 0x6aa   :  { %1971 = vperm.xlu1 %2461, %v1941_v21  }
 0x6ae   :  { %1981 = vperm.xlu1 %2461, %v1943_v54  }
 0x711   :  { %v1947_v51 = vpop.permute.xlu1 %1946 }
 0x712   :  { %2671 = vrcp.f32 %v1947_v51 }
 0x715   :  { %v1957_v47 = vpop.permute.xlu1 %1956  ;;  %v1952_v17 = vpop.permute.xlu0 %1951 }
 0x716   :  { %2673 = vrcp.f32 %v1957_v47 }
 0x717   :  { %2675 = vrcp.f32 %v1952_v17 }
 0x719   :  { %v1962_v28 = vpop.permute.xlu1 %1961 }
 0x71a   :  { %2677 = vrcp.f32 %v1962_v28 }
 0x71d   :  { %v1977_v43 = vpop.permute.xlu1 %1976 }
 0x71e   :  { %2679 = vrcp.f32 %v1977_v43 }
 0x71f   :  { %v2672_v31 = vpop.eup %2671 }
 0x720   :  { %v1985_v34 = vmul.f32 %v2672_v31, %v1897_v12 }
 0x721   :  { %v1967_v30 = vpop.permute.xlu1 %1966 }
 0x722   :  { %2681 = vrcp.f32 %v1967_v30  ;;  %v2008_v39 = vmul.f32 1.442695, %v1985_v34  ;;  %vm2000_vm1 = vcmp.gt.f32.partialorder %v1985_v34, 0.0 }
 0x723   :  { %v2674_v7 = vpop.eup %2673 }
 0x724   :  { %v2676_v61 = vpop.eup %2675  ;;  %2683 = vpow2.f32 %v2008_v39  ;;  %v1989_v5 = vmul.f32 %v2674_v7, %v2423_v60 }
 0x725   :  { %v1972_v50 = vpop.permute.xlu1 %1971  ;;  %v1987_v57 = vmul.f32 %v2676_v61, %v1900_v3 }
 0x726   :  { %2685 = vrcp.f32 %v1972_v50  ;;  %v2012_v40 = vmul.f32 1.442695, %v1989_v5  ;;  %vm2002_vm15 = vcmp.gt.f32.partialorder %v1989_v5, 0.0 }
 0x727   :  { %v2678_v56 = vpop.eup %2677  ;;  %v2010_v35 = vmul.f32 1.442695, %v1987_v57  ;;  %vm2001_vm0 = vcmp.gt.f32.partialorder %v1987_v57, 0.0 }
 0x728   :  { %2687 = vpow2.f32 %v2012_v40  ;;  %v1991_v55 = vmul.f32 %v2678_v56, %v2424_v18 }
 0x729   :  { %v1982_v58 = vpop.permute.xlu1 %1981  ;;  %2689 = vpow2.f32 %v2010_v35 }
 0x72a   :  { %2691 = vrcp.f32 %v1982_v58  ;;  %v2014_v11 = vmul.f32 1.442695, %v1991_v55  ;;  %vm2003_vm2 = vcmp.gt.f32.partialorder %v1991_v55, 0.0 }
 0x72b   :  { %v2680_v20 = vpop.eup %2679 }
 0x72c   :  { %2693 = vpow2.f32 %v2014_v11  ;;  %v1997_v14 = vmul.f32 %v2680_v20, %v2427_v1 }
 0x72e   :  { %v2020_v6 = vmul.f32 1.442695, %v1997_v14  ;;  %vm2006_vm5 = vcmp.gt.f32.partialorder %v1997_v14, 0.0 }
 0x72f   :  { %v2682_v46 = vpop.eup %2681 }
 0x730   :  { %v1993_v19 = vmul.f32 %v2682_v46, %v1913_v33  ;;  %2695 = vpow2.f32 %v2020_v6 }
 0x731   :  { %v2684_v36 = vpop.eup %2683 }
 0x732   :  { %v2219_v2 = vadd.f32 -1.0, %v2684_v36  ;;  %v2016_v0 = vmul.f32 1.442695, %v1993_v19  ;;  %vm2004_vm3 = vcmp.gt.f32.partialorder %v1993_v19, 0.0 }
 0x733   :  { %v2686_v62 = vpop.eup %2685 }
 0x734   :  { %v3913_v59 = vsel %vm2000_vm1, %v1985_v34, %v2219_v2  ;;  %2697 = vpow2.f32 %v2016_v0  ;;  %v1995_v16 = vmul.f32 %v2686_v62, %v1916_v10 }
 0x735   :  { %v2688_v45 = vpop.eup %2687  ;;  %v2041_v24 = vsel %vm2040_vm11, %v3913_v59, -inf }
 0x736   :  { %v2690_v44 = vpop.eup %2689  ;;  %2049 = vmax.xlane.f32.xlu1 %v2041_v24  ;;  %v2221_v27 = vadd.f32 -1.0, %v2688_v45  ;;  %v2018_v42 = vmul.f32 1.442695, %v1995_v16  ;;  %vm2005_vm6 = vcmp.gt.f32.partialorder %v1995_v16, 0.0 }
 0x737   :  { %v2692_v52 = vpop.eup %2691  ;;  %v2220_v48 = vadd.f32 -1.0, %v2690_v44 }
 0x738   :  { %v3918_v13 = vsel %vm2002_vm15, %v1989_v5, %v2221_v27  ;;  %2699 = vpow2.f32 %v2018_v42  ;;  %v1999_v37 = vmul.f32 %v2692_v52, %v3908_v22 }
 0x739   :  { %v2694_v41 = vpop.eup %2693  ;;  %v2043_v53 = vsel %vm2040_vm11, %v3918_v13, -inf  ;;  %v3924_v15 = vsel %vm2001_vm0, %v1987_v57, %v2220_v48 }
 0x73a   :  { %2053 = vmax.xlane.f32.xlu0 %v2043_v53  ;;  %v2222_v49 = vadd.f32 -1.0, %v2694_v41  ;;  %v2022_v63 = vmul.f32 1.442695, %v1999_v37  ;;  %v2042_v60 = vsel %vm2040_vm11, %v3924_v15, -inf  ;;  %vm2007_vm7 = vcmp.gt.f32.partialorder %v1999_v37, 0.0 }
 0x73c   :  { %v3926_v4 = vsel %vm2003_vm2, %v1991_v55, %v2222_v49  ;;  %2701 = vpow2.f32 %v2022_v63 }
 0x73d   :  { %v2044_v8 = vsel %vm2040_vm11, %v3926_v4, -inf  ;;  %v2696_v12 = vpop.eup %2695 }
 0x73e   :  { %2055 = vmax.xlane.f32.xlu1 %v2044_v8  ;;  %2051 = vmax.xlane.f32.xlu0 %v2042_v60  ;;  %v2225_v3 = vadd.f32 -1.0, %v2696_v12 }
 0x740   :  { %v3939_v33 = vsel %vm2006_vm5, %v1997_v14, %v2225_v3 }
 0x741   :  { %v2698_v18 = vpop.eup %2697  ;;  %v2047_v32 = vsel %vm2040_vm11, %v3939_v33, -inf }
 0x742   :  { %v2223_v26 = vadd.f32 -1.0, %v2698_v18 }
 0x744   :  { %v3934_v23 = vsel %vm2004_vm3, %v1993_v19, %v2223_v26 }
 0x745   :  { %v2700_v29 = vpop.eup %2699  ;;  %v2045_v1 = vsel %vm2040_vm11, %v3934_v23, -inf }
 0x746   :  { %2057 = vmax.xlane.f32.xlu0 %v2045_v1  ;;  %v2224_v38 = vadd.f32 -1.0, %v2700_v29 }
 0x748   :  { %v3941_v22 = vsel %vm2005_vm6, %v1995_v16, %v2224_v38 }
 0x749   :  { %v2702_v25 = vpop.eup %2701  ;;  %v2046_v10 = vsel %vm2040_vm11, %v3941_v22, -inf }
 0x74a   :  { %2059 = vmax.xlane.f32.xlu1 %v2046_v10  ;;  %2061 = vmax.xlane.f32.xlu0 %v2047_v32  ;;  %v2226_v21 = vadd.f32 -1.0, %v2702_v25 }
 0x74c   :  { %v3949_v54 = vsel %vm2007_vm7, %v1999_v37, %v2226_v21 }
 0x74d   :  { %v2048_v51 = vsel %vm2040_vm11, %v3949_v54, -inf }
 0x74e   :  { %2063 = vmax.xlane.f32.xlu1 %v2048_v51 }
 0x7bf   :  { %v3954_v47 = vpop.xlane.xlu1 %2049 }
 0x7c0   :  { %v2065_v17 = vsub.f32 %v2041_v24, %v3954_v47 }
 0x7c2   :  { %v2073_v34 = vmul.f32 1.442695, %v2065_v17 }
 0x7c3   :  { %v2054_v28 = vpop.xlane.xlu0 %2053 }
 0x7c4   :  { %v2067_v43 = vsub.f32 %v2043_v53, %v2054_v28 }
 0x7c6   :  { %v2077_v31 = vmul.f32 1.442695, %v2067_v43 }
 0x7c7   :  { %v3957_v30 = vpop.xlane.xlu1 %2055  ;;  %v3959_v39 = vpop.xlane.xlu0 %2051 }
 0x7c8   :  { %2703 = vpow2.f32 %v2077_v31  ;;  %v2068_v7 = vsub.f32 %v2044_v8, %v3957_v30  ;;  %v2066_v61 = vsub.f32 %v2042_v60, %v3959_v39 }
 0x7c9   :  { %2705 = vpow2.f32 %v2073_v34 }
 0x7ca   :  { %v2079_v5 = vmul.f32 1.442695, %v2068_v7  ;;  %v2075_v50 = vmul.f32 1.442695, %v2066_v61 }
 0x7cc   :  { %2707 = vpow2.f32 %v2079_v5 }
 0x7cd   :  { %2709 = vpow2.f32 %v2075_v50 }
 0x7cf   :  { %v3963_v57 = vpop.xlane.xlu0 %2057 }
 0x7d0   :  { %v2069_v40 = vsub.f32 %v2045_v1, %v3963_v57 }
 0x7d2   :  { %v2081_v56 = vmul.f32 1.442695, %v2069_v40 }
 0x7d3   :  { %v3966_v35 = vpop.xlane.xlu1 %2059  ;;  %v3968_v55 = vpop.xlane.xlu0 %2061 }
 0x7d4   :  { %2711 = vpow2.f32 %v2081_v56  ;;  %v2070_v58 = vsub.f32 %v2046_v10, %v3966_v35  ;;  %v2071_v11 = vsub.f32 %v2047_v32, %v3968_v55 }
 0x7d5   :  { %v2704_v20 = vpop.eup %2703 }
 0x7d6   :  { %v2083_v14 = vmul.f32 1.442695, %v2070_v58  ;;  %v2085_v6 = vmul.f32 1.442695, %v2071_v11  ;;  %2093 = vadd.xlane.f32.xlu0 %v2704_v20  ;;  %v2706_v19 = vpop.eup %2705 }
 0x7d7   :  { %v3972_v46 = vpop.xlane.xlu1 %2063 }
 0x7d8   :  { %2713 = vpow2.f32 %v2083_v14  ;;  %v2072_v36 = vsub.f32 %v2048_v51, %v3972_v46 }
 0x7d9   :  { %v2708_v2 = vpop.eup %2707  ;;  %2715 = vpow2.f32 %v2085_v6 }
 0x7da   :  { %v2087_v0 = vmul.f32 1.442695, %v2072_v36  ;;  %2095 = vadd.xlane.f32.xlu1 %v2708_v2  ;;  %2089 = vadd.xlane.f32.xlu0 %v2706_v19  ;;  %v2710_v62 = vpop.eup %2709 }
 0x7dc   :  { %2717 = vpow2.f32 %v2087_v0 }
 0x7de   :  { %2091 = vadd.xlane.f32.xlu1 %v2710_v62 }
 0x7e1   :  { %v2712_v16 = vpop.eup %2711 }
 0x7e2   :  { %2097 = vadd.xlane.f32.xlu0 %v2712_v16 }
 0x7e5   :  { %v2714_v45 = vpop.eup %2713 }
 0x7e6   :  { %v2716_v24 = vpop.eup %2715  ;;  %2099 = vadd.xlane.f32.xlu1 %v2714_v45 }
 0x7e7   :  { %2101 = vadd.xlane.f32.xlu0 %v2716_v24 }
 0x7e9   :  { %v2718_v44 = vpop.eup %2717 }
 0x7ea   :  { %2103 = vadd.xlane.f32.xlu1 %v2718_v44 }
 0x85f   :  { %v2094_v27 = vpop.xlane.xlu0 %2093 }
 0x860   :  { %2719 = vlog2.f32 %v2094_v27 }
 0x863   :  { %v2096_v42 = vpop.xlane.xlu1 %2095  ;;  %v2090_v52 = vpop.xlane.xlu0 %2089 }
 0x864   :  { %2721 = vlog2.f32 %v2096_v42 }
 0x865   :  { %2723 = vlog2.f32 %v2090_v52 }
 0x867   :  { %v2092_v48 = vpop.xlane.xlu1 %2091 }
 0x868   :  { %2725 = vlog2.f32 %v2092_v48 }
 0x86b   :  { %v2098_v37 = vpop.xlane.xlu0 %2097 }
 0x86c   :  { %2727 = vlog2.f32 %v2098_v37 }
 0x86d   :  { %v2720_v41 = vpop.eup %2719 }
 0x86e   :  { %v2110_v53 = vmul.f32 0.6931472, %v2720_v41 }
 0x86f   :  { %v2100_v49 = vpop.xlane.xlu1 %2099 }
 0x870   :  { %v2123_v63 = vadd.f32 %v2110_v53, %v2054_v28  ;;  %2729 = vlog2.f32 %v2100_v49  ;;  %v2102_v8 = vpop.xlane.xlu0 %2101 }
 0x871   :  { %v2722_v60 = vpop.eup %2721  ;;  %2731 = vlog2.f32 %v2102_v8 }
 0x872   :  { %v2724_v12 = vpop.eup %2723  ;;  %v2131_v18 = vsub.f32 %v3918_v13, %v2123_v63  ;;  %v2112_v26 = vmul.f32 0.6931472, %v2722_v60 }
 0x873   :  { %v2106_v3 = vmul.f32 0.6931472, %v2724_v12  ;;  %v2104_v29 = vpop.xlane.xlu1 %2103 }
 0x874   :  { %v2139_v1 = vsel %vm2040_vm11, %v2131_v18, 0.0  ;;  %v2124_v38 = vadd.f32 %v2112_v26, %v3957_v30  ;;  %2733 = vlog2.f32 %v2104_v29 }
 0x875   :  { %v2726_v25 = vpop.eup %2725  ;;  %2147 = vst [vmem:[%s4036_s6 + $0x10] sm:$0xff] %v2139_v1  ;;  %v2121_v10 = vadd.f32 %v2106_v3, %v3954_v47 }
 0x876   :  { %v2132_v32 = vsub.f32 %v3926_v4, %v2124_v38  ;;  %v2108_v21 = vmul.f32 0.6931472, %v2726_v25 }
 0x877   :  { %v2129_v13 = vsub.f32 %v3913_v59, %v2121_v10 }
 0x878   :  { %v2140_v51 = vsel %vm2040_vm11, %v2132_v32, 0.0  ;;  %v2122_v17 = vadd.f32 %v2108_v21, %v3959_v39 }
 0x879   :  { %v2728_v28 = vpop.eup %2727  ;;  %2148 = vst [vmem:[%s4036_s6 + $0x18] sm:$0xff] %v2140_v51  ;;  %v2137_v43 = vsel %vm2040_vm11, %v2129_v13, 0.0 }
 0x87a   :  { %2145 = vst [vmem:[%s4036_s6] sm:$0xff] %v2137_v43  ;;  %v2130_v4 = vsub.f32 %v3924_v15, %v2122_v17  ;;  %v2114_v59 = vmul.f32 0.6931472, %v2728_v28 }
 0x87c   :  { %v2138_v47 = vsel %vm2040_vm11, %v2130_v4, 0.0  ;;  %v2125_v31 = vadd.f32 %v2114_v59, %v3963_v57 }
 0x87d   :  { %v2730_v34 = vpop.eup %2729  ;;  %2146 = vst [vmem:[%s4036_s6 + $0x8] sm:$0xff] %v2138_v47 }
 0x87e   :  { %v2732_v30 = vpop.eup %2731  ;;  %v2133_v39 = vsub.f32 %v3934_v23, %v2125_v31  ;;  %v2116_v7 = vmul.f32 0.6931472, %v2730_v34 }
 0x87f   :  { %v2118_v61 = vmul.f32 0.6931472, %v2732_v30 }
 0x880   :  { %v2141_v5 = vsel %vm2040_vm11, %v2133_v39, 0.0  ;;  %v2126_v15 = vadd.f32 %v2116_v7, %v3966_v35 }
 0x881   :  { %v2734_v50 = vpop.eup %2733  ;;  %2149 = vst [vmem:[%s4036_s6 + $0x20] sm:$0xff] %v2141_v5  ;;  %v2127_v57 = vadd.f32 %v2118_v61, %v3968_v55 }
 0x882   :  { %v2134_v40 = vsub.f32 %v3941_v22, %v2126_v15  ;;  %v2120_v56 = vmul.f32 0.6931472, %v2734_v50 }
 0x883   :  { %v2135_v58 = vsub.f32 %v3939_v33, %v2127_v57 }
 0x884   :  { %v2142_v23 = vsel %vm2040_vm11, %v2134_v40, 0.0  ;;  %v2128_v11 = vadd.f32 %v2120_v56, %v3972_v46 }
 0x885   :  { %2150 = vst [vmem:[%s4036_s6 + $0x28] sm:$0xff] %v2142_v23  ;;  %v2143_v35 = vsel %vm2040_vm11, %v2135_v58, 0.0 }
 0x886   :  { %2151 = vst [vmem:[%s4036_s6 + $0x30] sm:$0xff] %v2143_v35  ;;  %v2136_v22 = vsub.f32 %v3949_v54, %v2128_v11 }
 0x888   :  { %v2144_v33 = vsel %vm2040_vm11, %v2136_v22, 0.0 }
 0x889   :  { %2152 = vst [vmem:[%s4036_s6 + $0x38] sm:$0xff] %v2144_v33 }

</bundles_post_ra>
